<compile_context>
chip_gen: v5e
topology: v5e:2x2
jax: 0.10.0
libtpu: 0.0.40
codegen_flags: <defaults>
</compile_context>

<pallas_src>
import jax
import jax.numpy as jnp
from jax.experimental import pallas as pl
from jax.experimental.pallas import tpu as pltpu


def _round_up(n, m):
    return ((n + m - 1) // m) * m


def mlp_kernel(x_ref, w1_ref, b1_ref, w2_ref, b2_ref, o_ref, h_acc):
    k = pl.program_id(1)

    @pl.when(k == 0)
    def _init():
        h_acc[...] = jnp.zeros_like(h_acc)

    # fc1 partial product: bf16 operands, f32 accumulation on the MXU.
    h_acc[...] += jnp.dot(x_ref[...], w1_ref[...],
                          preferred_element_type=jnp.float32)

    @pl.when(k == pl.num_programs(1) - 1)
    def _finish():
        # bias + sigmoid (exp and approx reciprocal both go to the EUP slot)
        h = h_acc[...] + b1_ref[...]
        h = pl.reciprocal(1.0 + jnp.exp(-h), approx=True)

        # fc2 (tiny: hid_pad x num_classes), kept in f32
        logits = jnp.dot(h, w2_ref[...],
                         preferred_element_type=jnp.float32) + b2_ref[...]

        # nn.Softmax(dim=1), numerically stable, exact normalization
        m = jnp.max(logits, axis=-1, keepdims=True)
        e = jnp.exp(logits - m)
        o_ref[...] = e / jnp.sum(e, axis=-1, keepdims=True)


def prepare_params(w1, b1, w2, b2):
    """One-time conversion from PyTorch layout to kernel layout.

    w1: (hid, in_f), b1: (hid,), w2: (ncls, hid), b2: (ncls,)
    Returns (w1_p bf16 (in_f_pad, hid_pad), b1_p f32 (1, hid_pad),
             w2_p f32 (hid_pad, ncls),      b2_p f32 (1, ncls)).
    """
    hid, in_f = w1.shape
    ncls = w2.shape[0]
    in_f_pad = _round_up(in_f, 128)
    hid_pad = _round_up(hid, 128)

    w1_p = jnp.zeros((in_f_pad, hid_pad), jnp.float32)
    w1_p = w1_p.at[:in_f, :hid].set(jnp.transpose(w1).astype(jnp.float32))
    b1_p = jnp.zeros((1, hid_pad), jnp.float32).at[0, :hid].set(b1.astype(jnp.float32))
    # Padded hidden rows of W2 must be exactly zero (padded units output 0.5).
    w2_p = jnp.zeros((hid_pad, ncls), jnp.float32)
    w2_p = w2_p.at[:hid, :].set(jnp.transpose(w2).astype(jnp.float32))
    b2_p = b2.reshape(1, ncls).astype(jnp.float32)
    return w1_p.astype(jnp.bfloat16), b1_p, w2_p, b2_p


def mlp_forward(x, params):
    """x: (B, ...) flattened to (B, in_f). Returns softmax probs (B, ncls)."""
    w1_p, b1_p, w2_p, b2_p = params
    in_f_pad, hid_pad = w1_p.shape
    ncls = w2_p.shape[1]

    B = x.shape[0]
    x2d = x.reshape(B, -1)
    in_f = x2d.shape[1]
    assert in_f <= in_f_pad

    # Pad batch to a sublane multiple and features to the padded K; cast to bf16.
    B_pad = _round_up(B, 8)
    x_pad = jnp.zeros((B_pad, in_f_pad), jnp.float32)
    x_pad = x_pad.at[:B, :in_f].set(x2d.astype(jnp.float32))
    x_pad = x_pad.astype(jnp.bfloat16)

    # Batch tile (full MXU-height tiles when batch is large; one block when toy).
    tb = 256 if B_pad % 256 == 0 else B_pad

    # K tile: largest multiple of 128 that divides in_f_pad and is <= 1024
    # (2688 -> tk = 896, 3 pipelined steps).
    n_lanes = in_f_pad // 128
    d_best = 1
    for d in range(1, n_lanes + 1):
        if n_lanes % d == 0 and 128 * d <= 1024:
            d_best = d
    tk = 128 * d_best

    grid = (B_pad // tb, in_f_pad // tk)

    flops = 2 * B_pad * (in_f_pad * hid_pad + hid_pad * ncls)
    bytes_accessed = (in_f_pad * hid_pad * 2      # W1 bf16
                      + B_pad * in_f_pad * 2      # x bf16
                      + hid_pad * ncls * 4        # W2 f32
                      + hid_pad * 4 + ncls * 4    # biases
                      + B_pad * ncls * 4)         # output

    out = pl.pallas_call(
        mlp_kernel,
        out_shape=jax.ShapeDtypeStruct((B_pad, ncls), jnp.float32),
        grid_spec=pltpu.PrefetchScalarGridSpec(
            num_scalar_prefetch=0,
            grid=grid,
            in_specs=[
                pl.BlockSpec((tb, tk), lambda b, k: (b, k)),          # x tile
                pl.BlockSpec((tk, hid_pad), lambda b, k: (k, 0)),     # W1 tile
                pl.BlockSpec((1, hid_pad), lambda b, k: (0, 0)),      # b1
                pl.BlockSpec((hid_pad, ncls), lambda b, k: (0, 0)),   # W2
                pl.BlockSpec((1, ncls), lambda b, k: (0, 0)),         # b2
            ],
            out_specs=pl.BlockSpec((tb, ncls), lambda b, k: (b, 0)),
            scratch_shapes=[pltpu.VMEM((tb, hid_pad), jnp.float32)],
        ),
        compiler_params=pltpu.CompilerParams(
            dimension_semantics=("parallel", "arbitrary"),
            vmem_limit_bytes=16 << 20,
        ),
        cost_estimate=pl.CostEstimate(
            flops=int(flops),
            transcendentals=int(B_pad * (hid_pad + ncls)),
            bytes_accessed=int(bytes_accessed),
        ),
    )(x_pad, w1_p, b1_p, w2_p, b2_p)

    return out[:B]


def init_params(key, input_size, hidden_size, num_classes):
    """Mirror the module: xavier_uniform_ weights, PyTorch Linear default bias
    uniform(-1/sqrt(fan_in), 1/sqrt(fan_in)). Returned in PyTorch (out, in) layout."""
    k1, k2, k3, k4 = jax.random.split(key, 4)

    def xavier(k, out_f, in_f):
        bound = jnp.sqrt(6.0 / (in_f + out_f))
        return jax.random.uniform(k, (out_f, in_f), jnp.float32, -bound, bound)

    def bias(k, out_f, in_f):
        bound = 1.0 / jnp.sqrt(in_f)
        return jax.random.uniform(k, (out_f,), jnp.float32, -bound, bound)

    w1 = xavier(k1, hidden_size, input_size)
    b1 = bias(k2, hidden_size, input_size)
    w2 = xavier(k3, num_classes, hidden_size)
    b2 = bias(k4, num_classes, hidden_size)
    return w1, b1, w2, b2


if __name__ == "__main__":
    # Module constants: input_size = 51*51 = 2601, hidden_size = 500.
    input_size = 51 * 51
    hidden_size = 500
    num_classes = 5
    batch = 8

    key = jax.random.PRNGKey(0)
    kx, kp = jax.random.split(key)

    # Input images as (B, 51, 51); forward flattens them (x.view(B, -1)).
    x = jax.random.normal(kx, (batch, 51, 51), jnp.float32)
    w1, b1, w2, b2 = init_params(kp, input_size, hidden_size, num_classes)

    # One-time parameter prep (transpose + pad + bf16) — not in the per-call path.
    params = prepare_params(w1, b1, w2, b2)

    out = mlp_forward(x, params)
    out = jax.block_until_ready(out)

    # sanity: shape and softmax rows sum to 1 (exact f32 normalization in-kernel)
    assert out.shape == (batch, num_classes)
    assert jnp.allclose(jnp.sum(out, axis=1), 1.0, atol=1e-5)

    # reference check against plain JAX in f32 (tolerance loosened for bf16 W1/x
    # and the approx reciprocal in the sigmoid)
    xf = x.reshape(batch, -1)
    h_ref = jax.nn.sigmoid(xf @ w1.T + b1)
    ref = jax.nn.softmax(h_ref @ w2.T + b2, axis=1)
    assert jnp.allclose(out, ref, atol=2e-2, rtol=2e-2)

    print("KERNEL_OK")
</pallas_src>

<mosaic_0001>
module attributes {stable_mosaic.version = 11 : i64} {
  func.func @mlp_kernel(%arg0: i32, %arg1: i32, %arg2: memref<8x896xbf16, #tpu.memory_space<vmem>>, %arg3: memref<896x512xbf16, #tpu.memory_space<vmem>>, %arg4: memref<1x512xf32, #tpu.memory_space<vmem>>, %arg5: memref<512x5xf32, #tpu.memory_space<vmem>>, %arg6: memref<1x5xf32, #tpu.memory_space<vmem>>, %arg7: memref<8x5xf32, #tpu.memory_space<vmem>>, %arg8: memref<8x512xf32, #tpu.memory_space<vmem>>) attributes {dimension_semantics = [#tpu.dimension_semantics<parallel>, #tpu.dimension_semantics<arbitrary>], iteration_bounds = array<i64: 1, 3>, scalar_prefetch = 0 : i64, scratch_operands = 1 : i64, tpu.core_type = #tpu.core_type<tc>, window_params = [{transform_indices = @transform_0, window_bounds = array<i64: 8, 896>}, {transform_indices = @transform_1, window_bounds = array<i64: 896, 512>}, {pipeline_mode = #tpu.pipeline_mode<synchronous>, transform_indices = @transform_2, window_bounds = array<i64: 1, 512>}, {pipeline_mode = #tpu.pipeline_mode<synchronous>, transform_indices = @transform_3, window_bounds = array<i64: 512, 5>}, {pipeline_mode = #tpu.pipeline_mode<synchronous>, transform_indices = @transform_4, window_bounds = array<i64: 1, 5>}, {transform_indices = @transform_5, window_bounds = array<i64: 8, 5>}]} {
    %c0_i32 = arith.constant 0 : i32
    %0 = arith.cmpi eq, %arg1, %c0_i32 : i32
    %1 = arith.extui %0 : i1 to i32
    %c0_i32_0 = arith.constant 0 : i32
    %2 = arith.cmpi ne, %1, %c0_i32_0 : i32
    scf.if %2 {
      %cst_9 = arith.constant 0.000000e+00 : f32
      %12 = vector.broadcast %cst_9 : f32 to vector<8x512xf32>
      %c0_10 = arith.constant 0 : index
      %c0_11 = arith.constant 0 : index
      %13 = vector.load %arg8[%c0_10, %c0_11] : memref<8x512xf32, #tpu.memory_space<vmem>>, vector<8x512xf32>
      tpu.vector_store %arg8[%c0_10, %c0_11], %12 {strides = array<i32>} : memref<8x512xf32, #tpu.memory_space<vmem>>, vector<8x512xf32>,
    } else {
    }
    %c0 = arith.constant 0 : index
    %c0_1 = arith.constant 0 : index
    %3 = vector.load %arg8[%c0, %c0_1] : memref<8x512xf32, #tpu.memory_space<vmem>>, vector<8x512xf32>
    %c0_2 = arith.constant 0 : index
    %c0_3 = arith.constant 0 : index
    %4 = vector.load %arg2[%c0_2, %c0_3] : memref<8x896xbf16, #tpu.memory_space<vmem>>, vector<8x896xbf16>
    %c0_4 = arith.constant 0 : index
    %c0_5 = arith.constant 0 : index
    %5 = vector.load %arg3[%c0_4, %c0_5] : memref<896x512xbf16, #tpu.memory_space<vmem>>, vector<896x512xbf16>
    %cst = arith.constant dense<0.000000e+00> : vector<8x512xf32>
    %6 = tpu.matmul %4, %5, %cst {dimension_numbers = #tpu.dot_dimension_numbers<[1], [0], [0], [1], [0, 0, 1, 1], [], []>} : vector<8x896xbf16>, vector<896x512xbf16>, vector<8x512xf32> -> vector<8x512xf32>
    %7 = arith.addf %3, %6 : vector<8x512xf32>
    %c0_6 = arith.constant 0 : index
    %c0_7 = arith.constant 0 : index
    %8 = vector.load %arg8[%c0_6, %c0_7] : memref<8x512xf32, #tpu.memory_space<vmem>>, vector<8x512xf32>
    tpu.vector_store %arg8[%c0_6, %c0_7], %7 {strides = array<i32>} : memref<8x512xf32, #tpu.memory_space<vmem>>, vector<8x512xf32>,
    %c2_i32 = arith.constant 2 : i32
    %9 = arith.cmpi eq, %arg1, %c2_i32 : i32
    %10 = arith.extui %9 : i1 to i32
    %c0_i32_8 = arith.constant 0 : i32
    %11 = arith.cmpi ne, %10, %c0_i32_8 : i32
    scf.if %11 {
      %c0_9 = arith.constant 0 : index
      %c0_10 = arith.constant 0 : index
      %12 = vector.load %arg8[%c0_9, %c0_10] : memref<8x512xf32, #tpu.memory_space<vmem>>, vector<8x512xf32>
      %c0_11 = arith.constant 0 : index
      %c0_12 = arith.constant 0 : index
      %13 = vector.load %arg4[%c0_11, %c0_12] : memref<1x512xf32, #tpu.memory_space<vmem>>, vector<1x512xf32>
      %14 = vector.broadcast %13 : vector<1x512xf32> to vector<8x512xf32>
      %15 = arith.addf %12, %14 : vector<8x512xf32>
      %cst_13 = arith.constant 0.000000e+00 : f32
      %16 = vector.broadcast %cst_13 : f32 to vector<8x512xf32>
      %17 = arith.subf %16, %15 : vector<8x512xf32>
      %18 = math.exp %17 : vector<8x512xf32>
      %cst_14 = arith.constant 1.000000e+00 : f32
      %19 = vector.broadcast %cst_14 : f32 to vector<8x512xf32>
      %20 = arith.addf %19, %18 : vector<8x512xf32>
      %21 = tpu.reciprocal %20 {approx = true} : vector<8x512xf32> -> vector<8x512xf32>
      %c0_15 = arith.constant 0 : index
      %c0_16 = arith.constant 0 : index
      %22 = vector.load %arg5[%c0_15, %c0_16] : memref<512x5xf32, #tpu.memory_space<vmem>>, vector<512x5xf32>
      %cst_17 = arith.constant dense<0.000000e+00> : vector<8x5xf32>
      %23 = tpu.matmul %21, %22, %cst_17 {dimension_numbers = #tpu.dot_dimension_numbers<[1], [0], [0], [1], [0, 0, 1, 1], [], []>} : vector<8x512xf32>, vector<512x5xf32>, vector<8x5xf32> -> vector<8x5xf32>
      %c0_18 = arith.constant 0 : index
      %c0_19 = arith.constant 0 : index
      %24 = vector.load %arg6[%c0_18, %c0_19] : memref<1x5xf32, #tpu.memory_space<vmem>>, vector<1x5xf32>
      %25 = vector.broadcast %24 : vector<1x5xf32> to vector<8x5xf32>
      %26 = arith.addf %23, %25 : vector<8x5xf32>
      %cst_20 = arith.constant dense<0xFF800000> : vector<8xf32>
      %27 = vector.multi_reduction <maximumf>, %26, %cst_20 [1] : vector<8x5xf32> to vector<8xf32>
      %28 = vector.shape_cast %27 : vector<8xf32> to vector<8x1xf32>
      %29 = vector.broadcast %28 : vector<8x1xf32> to vector<8x5xf32>
      %30 = arith.subf %26, %29 : vector<8x5xf32>
      %31 = math.exp %30 : vector<8x5xf32>
      %cst_21 = arith.constant dense<0.000000e+00> : vector<8xf32>
      %32 = vector.multi_reduction <add>, %31, %cst_21 [1] : vector<8x5xf32> to vector<8xf32>
      %33 = vector.shape_cast %32 : vector<8xf32> to vector<8x1xf32>
      %34 = vector.broadcast %33 : vector<8x1xf32> to vector<8x5xf32>
      %35 = arith.divf %31, %34 : vector<8x5xf32>
      %c0_22 = arith.constant 0 : index
      %c0_23 = arith.constant 0 : index
      %36 = vector.load %arg7[%c0_22, %c0_23] : memref<8x5xf32, #tpu.memory_space<vmem>>, vector<8x5xf32>
      tpu.vector_store %arg7[%c0_22, %c0_23], %35 {strides = array<i32>} : memref<8x5xf32, #tpu.memory_space<vmem>>, vector<8x5xf32>,
    } else {
    }
    return
  }
  func.func @transform_0(%arg0: i32, %arg1: i32) -> (i32, i32) {
    %c0_i32 = arith.constant 0 : i32
    return %arg0, %arg1 : i32, i32
  }
  func.func @transform_1(%arg0: i32, %arg1: i32) -> (i32, i32) {
    %c0_i32 = arith.constant 0 : i32
    %c0_i32_0 = arith.constant 0 : i32
    return %arg1, %c0_i32 : i32, i32
  }
  func.func @transform_2(%arg0: i32, %arg1: i32) -> (i32, i32) {
    %c0_i32 = arith.constant 0 : i32
    %c0_i32_0 = arith.constant 0 : i32
    %c0_i32_1 = arith.constant 0 : i32
    return %c0_i32, %c0_i32_0 : i32, i32
  }
  func.func @transform_3(%arg0: i32, %arg1: i32) -> (i32, i32) {
    %c0_i32 = arith.constant 0 : i32
    %c0_i32_0 = arith.constant 0 : i32
    %c0_i32_1 = arith.constant 0 : i32
    return %c0_i32, %c0_i32_0 : i32, i32
  }
  func.func @transform_4(%arg0: i32, %arg1: i32) -> (i32, i32) {
    %c0_i32 = arith.constant 0 : i32
    %c0_i32_0 = arith.constant 0 : i32
    %c0_i32_1 = arith.constant 0 : i32
    return %c0_i32, %c0_i32_0 : i32, i32
  }
  func.func @transform_5(%arg0: i32, %arg1: i32) -> (i32, i32) {
    %c0_i32 = arith.constant 0 : i32
    %c0_i32_0 = arith.constant 0 : i32
    return %arg0, %c0_i32 : i32, i32
  }
}

</mosaic_0001>

<bundles_post_ra>
// kernel: tpu_custom_call.1
= control target key start
LH: loop header
LB: loop body
LE: loop exit
PB: predicated region body
PF: predicated region fallthrough
CT: control target
= control target key end

     0   :  { %s4757_s0 = inlined_call_operand.hbm [shape: bf16[8,2688], index: 0, kind: input, shape index: {}]   ;;  %s4758_s1 = inlined_call_operand.hbm [shape: bf16[2688,512], index: 1, kind: input, shape index: {}]   ;;  %s4759_s2 = inlined_call_operand.hbm [shape: f32[1,512], index: 2, kind: input, shape index: {}]   ;;  %s4760_s3 = inlined_call_operand.vmem [shape: f32[512,5], index: 3, kind: input, shape index: {}]   ;;  %s4761_s4 = inlined_call_operand.hbm [shape: f32[1,5], index: 4, kind: input, shape index: {}]   ;;  %s4762_s5 = inlined_call_operand.hbm [shape: f32[8,5], index: 5, kind: output, shape index: {}]  }
   0x1   :  { %4764 = sst [smem:[#allocation18_spill]] %s4759_s2 }
   0x2   :  { %4765 = sst [smem:[#allocation19_spill]] %s4761_s4 }
   0x3   :  { %10 = vsyncpa [#allocation4], 0 }
   0x4   :  { %12 = vsyncpa [#allocation4 + $0x1], 0 }
   0x5   :  { %13 = vsyncpa [#allocation7], 0 }
   0x6   :  { %15 = vsyncpa [#allocation7 + $0x1], 0 }
   0x7   :  { %16 = vsyncpa [#allocation10], 0 }
   0x8   :  { %17 = vsyncpa [#allocation5], 0  ;;  %s3925_s18 = smov 0   ;;  %s3927_s19 = smov 0  }
   0x9   :  { %s3929_s20 = smov 0   ;;  %s3931_s21 = smov 0  }
   0xa   :  { %s3933_s22 = smov 0   ;;  %s3935_s23 = smov 0  }
   0xb LB: > { %s3954_s24 = sadd.s32 4294967295, %s3887_s23   ;;  %p57_p0 = scmp.ne.s32.totalorder %s3871_s19, %s3867_s18  ;;  %s3887_s23 = sphi %s3935_s23, %s23_s23   ;;  %s3883_s22 = sphi %s3933_s22, %s4777_s22   ;;  %s3879_s21 = sphi %s3931_s21, %s4776_s21   ;;  %s3875_s20 = sphi %s3929_s20, %s4775_s20   ;;  %s3871_s19 = sphi %s3927_s19, %s4774_s19   ;;  %s3867_s18 = sphi %s3925_s18, %s4773_s18  }
   0xc   : > { %p58_p1 = scmp.eq.s32.totalorder %s3954_s24, 0  ;;  %p2417_p2 = scmp.ge.s32.totalorder %s3887_s23, 1 }
   0xd   : > { %p183_p3 = scmp.lt.s32.totalorder %s3887_s23, 4  ;;  %s4767_s2 = sld [smem:[#allocation18_spill]] }
   0xe   : > { %p3962_p4 = por %p58_p1, %p57_p0  ;;  %s3889_s30 = smov [#allocation8]  }
   0xf   : > { %p3969_p5 = pnand %p2417_p2, %p183_p3  ;;  %s197_s6 = sshll.u32 %s3889_s30, 4  ;;  %s198_s6 = int_to_ptr.vmem [resolvable:$true] %s197_s6 }
  0x10   : > { %s4769_s4 = sld [smem:[#allocation19_spill]]  ;;  %s3890_s10 = smov [#allocation9]  }
  0x11   : > { %p3577_p6 = pneg %p3969_p5  ;;  %s212_s11 = sshll.u32 %s3890_s10, 4  ;;  %s213_s11 = int_to_ptr.vmem [resolvable:$true] %s212_s11 }
  0x12   : > { %s32_s12 = sadd.s32 1, %s3883_s22  ;;  %s44_s13 = sadd.s32 1, %s3875_s20 }
  0x13   : > { %s195_s28 = sshll.u32 %s4767_s2, 4  ;;  %p3578_p7 = pnand %p3577_p6, %p58_p1  ;;  %s196_s28 = int_to_ptr.hbm [resolvable:$true] %s195_s28 }
  0x14   : > { %p33_p8 = scmp.ge.s32.totalorder %s32_s12, 3  ;;  %p51_p9 = scmp.ne.s32.totalorder %s3875_s20, %s3871_s19 }
  0x15   : > { %3580 = dma.hbm_to_vmem [thread:$0]  (!%p3578_p7), %s196_s28, 64, %s198_s6, [#allocation7]  }
  0x16   : > { %s210_s9 = sshll.u32 %s4769_s4, 4  ;;  %p52_p10 = scmp.eq.s32.totalorder %s3887_s23, 0  ;;  %s211_s9 = int_to_ptr.hbm [resolvable:$true] %s210_s9 }
  0x17   : > { %3583 = dma.hbm_to_vmem [thread:$0]  (!%p3578_p7), %s211_s9, 16, %s213_s11, [#allocation10]  }
  0x18   : > { %p3593_p11 = scmp.lt.s32.totalorder %s3887_s23, 3  ;;  %s4779_s12 = smov (%p33_p8, %s32_s12), 0 }
  0x19   : > { %4770 = sst [smem:[#allocation17_spill]] %s4779_s12  ;;  %p53_p12 = por %p52_p10, %p51_p9 }
  0x1a   : > { %s223_s14 = sand.u32 1, %s3875_s20   ;;  %s40_s15 = ssub.s32 %s3883_s22, %s4779_s12 }
  0x1b   : > { %p42_p13 = scmp.eq.s32.totalorder %s40_s15, 0  ;;  %s3557_s16 = smul.u32 28, %s223_s14 }
  0x1c   : > { %s3329_s17 = smul.u32 28, %s3883_s22  ;;  %p3992_p0 = pnand %p3593_p11, %p53_p12 }
  0x1d   : > { %s3997_s26 = scalar_select %p42_p13, %s3875_s20, %s44_s13  }
  0x1e   : > { %s234_s30 = scalar_lea.hbm %s4757_s0, %s3329_s17  ;;  %s227_s7 = scalar_lea.vmem [#allocation3], %s3557_s16 }
  0x1f   : > { %s236_s6 = sshll.u32 %s234_s30, 4  ;;  %s238_s8 = sshll.u32 %s227_s7, 4  ;;  %s237_s6 = int_to_ptr.hbm [resolvable:$true] %s236_s6  ;;  %s239_s8 = int_to_ptr.vmem [resolvable:$true] %s238_s8 }
  0x20   : > { %s3558_s9 = smul.u32 1792, %s223_s14  ;;  %s224_s10 = scalar_lea.sflag [#allocation4], %s223_s14 }
  0x21   : > { %3587 = dma.hbm_to_vmem [thread:$0]  (!%p3992_p0), %s237_s6, 448, %s239_s8, %s224_s10  }
  0x22   : > { %s3556_s11 = smul.u32 1792, %s3883_s22  ;;  %s249_s15 = scalar_lea.vmem [#allocation6], %s3558_s9 }
  0x23   : > { %s258_s2 = sshll.u32 %s249_s15, 4  ;;  %s245_s4 = sand.u32 1, %s3887_s23   ;;  %s259_s2 = int_to_ptr.vmem [resolvable:$true] %s258_s2 }
  0x24   : > { %s255_s27 = scalar_lea.hbm %s4758_s1, %s3556_s11  ;;  %s246_s16 = scalar_lea.sflag [#allocation7], %s245_s4 }
  0x25   : > { %s256_s17 = sshll.u32 %s255_s27, 4  ;;  %s3891_s28 = smov 256   ;;  %s257_s17 = int_to_ptr.hbm [resolvable:$true] %s256_s17 }
  0x26   : > { %s3892_s30 = smov 16   ;;  %270 = sbr.rel (%p3969_p5) target bundleno = 883 (0x373), region = 40 }
  0x27   : > { %3590 = dma.hbm_to_vmem [thread:$0]  (!%p3992_p0), %s257_s17, 28672, %s259_s2, %s246_s16, %s3891_s28, %s3891_s28, %s3892_s30  }
  0x28   : > { %s272_s14 = sand.u32 (!%p3969_p5), 1, %s3871_s19  }
  0x29   : > { %s3559_s6 = smul.u32 (!%p3969_p5), 28, %s272_s14  ;;  %s273_s7 = scalar_lea.sflag (!%p3969_p5), [#allocation4], %s272_s14 }
  0x2b   : > { %s4014_s8 = scalar_lea.vmem [#allocation3], %s3559_s6 }
  0x2c   : > { %3846 = dma.done.wait (%p3962_p4), %s273_s7, 448  }
  0x2d   : > { %3848 = vsyncadd (%p3962_p4), %s273_s7, 4294966848  ;;  %s282_s4 = sand.u32 1, %s3954_s24   ;;  %s3560_s12 = smul.u32 1792, %s272_s14 }
  0x2e   : > { %s283_s2 = scalar_lea.sflag [#allocation7], %s282_s4 }
  0x2f   : > { %s4021_s18 = scalar_lea.vmem [#allocation6], %s3560_s12 }
  0x30   : > { %3850 = dma.done.wait (%p3962_p4), %s283_s2, 28672  }
  0x31   : > { %3852 = vsyncadd (%p3962_p4), %s283_s2, 4294938624 }
  0x32   : > { %3854 = dma.done.wait (%p58_p1), [#allocation7], 64  }
  0x33   : > { %3856 = vsyncadd (%p58_p1), [#allocation7], 4294967232 }
  0x34   : > { %3858 = dma.done.wait (%p58_p1), [#allocation10], 16  }
  0x35   : > { %3860 = vsyncadd (%p58_p1), [#allocation10], 4294967280  ;;  %p2427_p2 = scmp.ne.s32.totalorder %s3879_s21, 0 }
  0x37   : > { %329 = sbr.rel (%p2427_p2) target bundleno = 65 (0x41), region = 60 }
  0x3c   : > { %v3893_v0 = vmov 0.0  }
  0x3d   : > { %330 = vst [vmem:[#allocation2 + $0x10] sm:$0xff] %v3893_v0 }
  0x3e   : > { %331 = vst [vmem:[#allocation2] sm:$0xff] %v3893_v0 }
  0x3f   : > { %332 = vst [vmem:[#allocation2 + $0x18] sm:$0xff] %v3893_v0 }
  0x40   : > { %333 = vst [vmem:[#allocation2 + $0x8] sm:$0xff] %v3893_v0 }
  0x41 PF: > { %v2542_v1 = vld [vmem:[%s4021_s18 + $0xe0] sm:$0xf]  ;;  %v3362_v2 = vld [vmem:[%s4021_s18 + $0xec] sm:$0xf0]  ;;  %p3324_p1 = scmp.ne.s32.totalorder %s3879_s21, 2 }
  0x42   : > { %v2670_v3 = vld [vmem:[%s4021_s18 + $0x1e0] sm:$0xf]  ;;  %v2543_v4 = vor.u32 %v3362_v2, %v2542_v1  ;;  %v3394_v5 = vld [vmem:[%s4021_s18 + $0x1ec] sm:$0xf0] }
  0x43   : > { %v2798_v6 = vld [vmem:[%s4021_s18 + $0x2e0] sm:$0xf]  ;;  %v3426_v7 = vld [vmem:[%s4021_s18 + $0x2ec] sm:$0xf0]  ;;  %v2671_v8 = vor.u32 %v3394_v5, %v2670_v3 }
  0x44   : > { %v2799_v9 = vor.u32 %v3426_v7, %v2798_v6  ;;  %v2926_v10 = vld [vmem:[%s4021_s18 + $0x3e0] sm:$0xf]  ;;  %v3458_v11 = vld [vmem:[%s4021_s18 + $0x3ec] sm:$0xf0]  ;;  %1711 = vmatpush.bf16.msra.mxu0 %v2543_v4 }
  0x45   : > { %v2526_v12 = vld [vmem:[%s4021_s18 + $0xc0] sm:$0xf]  ;;  %v2927_v13 = vor.u32 %v3458_v11, %v2926_v10  ;;  %v3358_v14 = vld [vmem:[%s4021_s18 + $0xcc] sm:$0xf0]  ;;  %1724 = vmatpush.bf16.msra.mxu1 %v2671_v8 }
  0x46   : > { %v2654_v15 = vld [vmem:[%s4021_s18 + $0x1c0] sm:$0xf]  ;;  %v3390_v16 = vld [vmem:[%s4021_s18 + $0x1cc] sm:$0xf0]  ;;  %1737 = vmatpush.bf16.msra.mxu2 %v2799_v9  ;;  %v2527_v17 = vor.u32 %v3358_v14, %v2526_v12 }
  0x47   : > { %v2655_v18 = vor.u32 %v3390_v16, %v2654_v15  ;;  %v2782_v19 = vld [vmem:[%s4021_s18 + $0x2c0] sm:$0xf]  ;;  %v3422_v20 = vld [vmem:[%s4021_s18 + $0x2cc] sm:$0xf0]  ;;  %1750 = vmatpush.bf16.msra.mxu3 %v2927_v13 }
  0x48   : > { %v2910_v21 = vld [vmem:[%s4021_s18 + $0x3c0] sm:$0xf]  ;;  %v2783_v22 = vor.u32 %v3422_v20, %v2782_v19  ;;  %v3454_v23 = vld [vmem:[%s4021_s18 + $0x3cc] sm:$0xf0]  ;;  %1712 = vmatpush.bf16.msra.mxu0 %v2527_v17 }
  0x49   : > { %v2510_v24 = vld [vmem:[%s4021_s18 + $0xa0] sm:$0xf]  ;;  %v3354_v25 = vld [vmem:[%s4021_s18 + $0xac] sm:$0xf0]  ;;  %v2911_v26 = vor.u32 %v3454_v23, %v2910_v21  ;;  %1725 = vmatpush.bf16.msra.mxu1 %v2655_v18 }
  0x4a   : > { %v2638_v27 = vld [vmem:[%s4021_s18 + $0x1a0] sm:$0xf]  ;;  %v3386_v28 = vld [vmem:[%s4021_s18 + $0x1ac] sm:$0xf0]  ;;  %v2511_v30 = vor.u32 %v3354_v25, %v2510_v24  ;;  %1738 = vmatpush.bf16.msra.mxu2 %v2783_v22 }
  0x4b   : > { %v2766_v29 = vld [vmem:[%s4021_s18 + $0x2a0] sm:$0xf]  ;;  %v3418_v31 = vld [vmem:[%s4021_s18 + $0x2ac] sm:$0xf0]  ;;  %v2639_v34 = vor.u32 %v3386_v28, %v2638_v27  ;;  %1751 = vmatpush.bf16.msra.mxu3 %v2911_v26 }
  0x4c   : > { %v2894_v32 = vld [vmem:[%s4021_s18 + $0x3a0] sm:$0xf]  ;;  %v3450_v33 = vld [vmem:[%s4021_s18 + $0x3ac] sm:$0xf0]  ;;  %v2767_v35 = vor.u32 %v3418_v31, %v2766_v29  ;;  %1713 = vmatpush.bf16.msra.mxu0 %v2511_v30 }
  0x4d   : > { %v2494_v36 = vld [vmem:[%s4021_s18 + $0x80] sm:$0xf]  ;;  %v3350_v37 = vld [vmem:[%s4021_s18 + $0x8c] sm:$0xf0]  ;;  %v2895_v39 = vor.u32 %v3450_v33, %v2894_v32  ;;  %1726 = vmatpush.bf16.msra.mxu1 %v2639_v34 }
  0x4e   : > { %v2622_v38 = vld [vmem:[%s4021_s18 + $0x180] sm:$0xf]  ;;  %v3382_v40 = vld [vmem:[%s4021_s18 + $0x18c] sm:$0xf0]  ;;  %v2495_v45 = vor.u32 %v3350_v37, %v2494_v36  ;;  %1739 = vmatpush.bf16.msra.mxu2 %v2767_v35 }
  0x4f   : > { %v2750_v41 = vld [vmem:[%s4021_s18 + $0x280] sm:$0xf]  ;;  %v3414_v42 = vld [vmem:[%s4021_s18 + $0x28c] sm:$0xf0]  ;;  %v2623_v46 = vor.u32 %v3382_v40, %v2622_v38  ;;  %1752 = vmatpush.bf16.msra.mxu3 %v2895_v39  ;;  %v3360_v38 = vld [vmem:[%s4021_s18 + $0xe4] sm:$0xf] }
  0x50   : > { %v2878_v43 = vld [vmem:[%s4021_s18 + $0x380] sm:$0xf]  ;;  %v3446_v44 = vld [vmem:[%s4021_s18 + $0x38c] sm:$0xf0]  ;;  %v2751_v47 = vor.u32 %v3414_v42, %v2750_v41  ;;  %1714 = vmatpush.bf16.msra.mxu0 %v2495_v45  ;;  %v2544_v39 = vld [vmem:[%s4021_s18 + $0xf0] sm:$0xf0] }
  0x51   : > { %v2478_v48 = vld [vmem:[%s4021_s18 + $0x60] sm:$0xf]  ;;  %v3346_v49 = vld [vmem:[%s4021_s18 + $0x6c] sm:$0xf0]  ;;  %v2879_v51 = vor.u32 %v3446_v44, %v2878_v43  ;;  %1727 = vmatpush.bf16.msra.mxu1 %v2623_v46 }
  0x52   : > { %v2606_v50 = vld [vmem:[%s4021_s18 + $0x160] sm:$0xf]  ;;  %v3378_v52 = vld [vmem:[%s4021_s18 + $0x16c] sm:$0xf0]  ;;  %v2479_v57 = vor.u32 %v3346_v49, %v2478_v48  ;;  %1740 = vmatpush.bf16.msra.mxu2 %v2751_v47  ;;  %v2547_v47 = vor.u32 %v3360_v38, %v2544_v39 }
  0x53   : > { %v2734_v53 = vld [vmem:[%s4021_s18 + $0x260] sm:$0xf]  ;;  %v3410_v54 = vld [vmem:[%s4021_s18 + $0x26c] sm:$0xf0]  ;;  %v2607_v58 = vor.u32 %v3378_v52, %v2606_v50  ;;  %1753 = vmatpush.bf16.msra.mxu3 %v2879_v51  ;;  %v3356_v51 = vld [vmem:[%s4021_s18 + $0xc4] sm:$0xf] }
  0x54   : > { %v2862_v55 = vld [vmem:[%s4021_s18 + $0x360] sm:$0xf]  ;;  %v3442_v56 = vld [vmem:[%s4021_s18 + $0x36c] sm:$0xf0]  ;;  %v2735_v59 = vor.u32 %v3410_v54, %v2734_v53  ;;  %1715 = vmatpush.bf16.msra.mxu0 %v2479_v57  ;;  %v2528_v52 = vld [vmem:[%s4021_s18 + $0xd0] sm:$0xf0] }
  0x55   : > { %v2462_v60 = vld [vmem:[%s4021_s18 + $0x40] sm:$0xf]  ;;  %v3342_v61 = vld [vmem:[%s4021_s18 + $0x4c] sm:$0xf0]  ;;  %v2863_v63 = vor.u32 %v3442_v56, %v2862_v55  ;;  %1728 = vmatpush.bf16.msra.mxu1 %v2607_v58 }
  0x56   : > { %v2590_v62 = vld [vmem:[%s4021_s18 + $0x140] sm:$0xf]  ;;  %v3374_v0 = vld [vmem:[%s4021_s18 + $0x14c] sm:$0xf0]  ;;  %v2463_v5 = vor.u32 %v3342_v61, %v2462_v60  ;;  %1741 = vmatpush.bf16.msra.mxu2 %v2735_v59  ;;  %v2531_v60 = vor.u32 %v3356_v51, %v2528_v52 }
  0x57   : > { %v2718_v1 = vld [vmem:[%s4021_s18 + $0x240] sm:$0xf]  ;;  %v3406_v2 = vld [vmem:[%s4021_s18 + $0x24c] sm:$0xf0]  ;;  %v2591_v6 = vor.u32 %v3374_v0, %v2590_v62  ;;  %1754 = vmatpush.bf16.msra.mxu3 %v2863_v63 }
  0x58   : > { %v2846_v3 = vld [vmem:[%s4021_s18 + $0x340] sm:$0xf]  ;;  %v3438_v4 = vld [vmem:[%s4021_s18 + $0x34c] sm:$0xf0]  ;;  %v2719_v7 = vor.u32 %v3406_v2, %v2718_v1  ;;  %1716 = vmatpush.bf16.msra.mxu0 %v2463_v5  ;;  %v3352_v2 = vld [vmem:[%s4021_s18 + $0xa4] sm:$0xf] }
  0x59   : > { %v2446_v8 = vld [vmem:[%s4021_s18 + $0x20] sm:$0xf]  ;;  %v3338_v9 = vld [vmem:[%s4021_s18 + $0x2c] sm:$0xf0]  ;;  %v2847_v11 = vor.u32 %v3438_v4, %v2846_v3  ;;  %1729 = vmatpush.bf16.msra.mxu1 %v2591_v6  ;;  %v2512_v3 = vld [vmem:[%s4021_s18 + $0xb0] sm:$0xf0] }
  0x5a   : > { %v2574_v10 = vld [vmem:[%s4021_s18 + $0x120] sm:$0xf]  ;;  %v3370_v12 = vld [vmem:[%s4021_s18 + $0x12c] sm:$0xf0]  ;;  %v2447_v17 = vor.u32 %v3338_v9, %v2446_v8  ;;  %1742 = vmatpush.bf16.msra.mxu2 %v2719_v7  ;;  %v338_v6 = vld [vmem:[%s4014_s8] sm:$0xff] }
  0x5b   : > { %v2702_v13 = vld [vmem:[%s4021_s18 + $0x220] sm:$0xf]  ;;  %v3402_v14 = vld [vmem:[%s4021_s18 + $0x22c] sm:$0xf0]  ;;  %v2575_v20 = vor.u32 %v3370_v12, %v2574_v10  ;;  %1755 = vmatpush.bf16.msra.mxu3 %v2847_v11 }
  0x5c   : > { %v2830_v15 = vld [vmem:[%s4021_s18 + $0x320] sm:$0xf]  ;;  %v3434_v16 = vld [vmem:[%s4021_s18 + $0x32c] sm:$0xf0]  ;;  %v2703_v21 = vor.u32 %v3402_v14, %v2702_v13  ;;  %1717 = vmatpush.bf16.msra.mxu0 %v2447_v17  ;;  %v570_v13 = vunpack.c.l.b16 %v338_v6  ;;  %v571_v14 = vunpack.c.h.b16 %v338_v6 }
  0x5d   : > { %v2430_v18 = vld [vmem:[%s4021_s18] sm:$0xf]  ;;  %v3334_v19 = vld [vmem:[%s4021_s18 + $0xc] sm:$0xf0]  ;;  %v2831_v25 = vor.u32 %v3434_v16, %v2830_v15  ;;  %1730 = vmatpush.bf16.msra.mxu1 %v2575_v20  ;;  %v2515_v15 = vor.u32 %v3352_v2, %v2512_v3  ;;  %v2496_v20 = vld [vmem:[%s4021_s18 + $0x90] sm:$0xf0] }
  0x5e   : > { %v2558_v22 = vld [vmem:[%s4021_s18 + $0x100] sm:$0xf]  ;;  %v3366_v23 = vld [vmem:[%s4021_s18 + $0x10c] sm:$0xf0]  ;;  %v2431_v32 = vor.u32 %v3334_v19, %v2430_v18  ;;  %1743 = vmatpush.bf16.msra.mxu2 %v2703_v21  ;;  %v3348_v19 = vld [vmem:[%s4021_s18 + $0x84] sm:$0xf]  ;;  %v4139_v21 = vpack.c.b16 %v570_v13, %v570_v13 }
  0x5f   : > { %v2686_v24 = vld [vmem:[%s4021_s18 + $0x200] sm:$0xf]  ;;  %v3398_v26 = vld [vmem:[%s4021_s18 + $0x20c] sm:$0xf0]  ;;  %v2559_v36 = vor.u32 %v3366_v23, %v2558_v22  ;;  %1756 = vmatpush.bf16.msra.mxu3 %v2831_v25  ;;  %v4142_v22 = vpack.c.b16 %v571_v14, %v571_v14  ;;  %v3424_v13 = vld [vmem:[%s4021_s18 + $0x2e4] sm:$0xf] }
  0x60   : > { %v2814_v27 = vld [vmem:[%s4021_s18 + $0x300] sm:$0xf]  ;;  %v3430_v28 = vld [vmem:[%s4021_s18 + $0x30c] sm:$0xf0]  ;;  %v2687_v37 = vor.u32 %v3398_v26, %v2686_v24  ;;  %1718 = vmatpush.bf16.msra.mxu0 %v2431_v32 }
  0x61   : > { %v3054_v29 = vld [vmem:[%s4021_s18 + $0x4e0] sm:$0xf]  ;;  %v3490_v30 = vld [vmem:[%s4021_s18 + $0x4ec] sm:$0xf0]  ;;  %v2815_v40 = vor.u32 %v3430_v28, %v2814_v27  ;;  %1731 = vmatpush.bf16.msra.mxu1 %v2559_v36 }
  0x62   : > { %v3182_v31 = vld [vmem:[%s4021_s18 + $0x5e0] sm:$0xf]  ;;  %v3522_v33 = vld [vmem:[%s4021_s18 + $0x5ec] sm:$0xf0]  ;;  %v3055_v41 = vor.u32 %v3490_v30, %v3054_v29  ;;  %1744 = vmatpush.bf16.msra.mxu2 %v2687_v37  ;;  %v2499_v29 = vor.u32 %v3348_v19, %v2496_v20 }
  0x63   : > { %v3310_v34 = vld [vmem:[%s4021_s18 + $0x6e0] sm:$0xf]  ;;  %v3554_v35 = vld [vmem:[%s4021_s18 + $0x6ec] sm:$0xf0]  ;;  %v3183_v42 = vor.u32 %v3522_v33, %v3182_v31  ;;  %1757 = vmatpush.bf16.msra.mxu3 %v2815_v40  ;;  %1719 = vmatmul.bf16.vlgmr.msra.gmra.mxu0 %v4139_v21  ;;  %v3344_v33 = vld [vmem:[%s4021_s18 + $0x64] sm:$0xf] }
  0x64   : > { %v3311_v43 = vor.u32 %v3554_v35, %v3310_v34  ;;  %v3038_v44 = vld [vmem:[%s4021_s18 + $0x4c0] sm:$0xf]  ;;  %v3486_v45 = vld [vmem:[%s4021_s18 + $0x4cc] sm:$0xf0]  ;;  %1763 = vmatpush.bf16.msrb.mxu0 %v3055_v41  ;;  %v2480_v34 = vld [vmem:[%s4021_s18 + $0x70] sm:$0xf0]  ;;  %1732 = vmatmul.bf16.vlgmr.msra.gmra.mxu1 %v4142_v22 }
  0x65   : > { %v3166_v46 = vld [vmem:[%s4021_s18 + $0x5c0] sm:$0xf]  ;;  %v3518_v48 = vld [vmem:[%s4021_s18 + $0x5cc] sm:$0xf0]  ;;  %v3039_v53 = vor.u32 %v3486_v45, %v3038_v44  ;;  %1776 = vmatpush.bf16.msrb.mxu1 %v3183_v42  ;;  %v2483_v41 = vor.u32 %v3344_v33, %v2480_v34  ;;  %v3340_v45 = vld [vmem:[%s4021_s18 + $0x44] sm:$0xf] }
  0x66   : > { %v3294_v49 = vld [vmem:[%s4021_s18 + $0x6c0] sm:$0xf]  ;;  %v3550_v50 = vld [vmem:[%s4021_s18 + $0x6cc] sm:$0xf0]  ;;  %1789 = vmatpush.bf16.msrb.mxu2 %v3311_v43  ;;  %v3167_v55 = vor.u32 %v3518_v48, %v3166_v46  ;;  %v2464_v46 = vld [vmem:[%s4021_s18 + $0x50] sm:$0xf0] }
  0x67   : > { %v3022_v54 = vld [vmem:[%s4021_s18 + $0x4a0] sm:$0xf]  ;;  %v3295_v56 = vor.u32 %v3550_v50, %v3294_v49  ;;  %v3482_v57 = vld [vmem:[%s4021_s18 + $0x4ac] sm:$0xf0]  ;;  %1802 = vmatpush.bf16.msrb.mxu3 %v2547_v47  ;;  %v3420_v33 = vld [vmem:[%s4021_s18 + $0x2c4] sm:$0xf] }
  0x68   : > { %v3150_v58 = vld [vmem:[%s4021_s18 + $0x5a0] sm:$0xf]  ;;  %v339_v59 = vld [vmem:[%s4014_s8 + $0x8] sm:$0xff]  ;;  %1764 = vmatpush.bf16.msrb.mxu0 %v3039_v53  ;;  %v3023_v4 = vor.u32 %v3482_v57, %v3022_v54  ;;  %v2467_v53 = vor.u32 %v3340_v45, %v2464_v46  ;;  %v3336_v57 = vld [vmem:[%s4021_s18 + $0x24] sm:$0xf] }
  0x69   : > { %v3514_v61 = vld [vmem:[%s4021_s18 + $0x5ac] sm:$0xf0]  ;;  %v3278_v62 = vld [vmem:[%s4021_s18 + $0x6a0] sm:$0xf]  ;;  %v572_v0 = vunpack.c.l.b16 %v339_v59  ;;  %v573_v1 = vunpack.c.h.b16 %v339_v59  ;;  %1777 = vmatpush.bf16.msrb.mxu1 %v3167_v55  ;;  %v3384_v46 = vld [vmem:[%s4021_s18 + $0x1a4] sm:$0xf] }
  0x6a   : > { %v3546_v63 = vld [vmem:[%s4021_s18 + $0x6ac] sm:$0xf0]  ;;  %1790 = vmatpush.bf16.msrb.mxu2 %v3295_v56  ;;  %v3151_v8 = vor.u32 %v3514_v61, %v3150_v58  ;;  %v3006_v10 = vld [vmem:[%s4021_s18 + $0x480] sm:$0xf]  ;;  %v2448_v58 = vld [vmem:[%s4021_s18 + $0x30] sm:$0xf0] }
  0x6b   : > { %v4125_v5 = vpack.c.b16 %v572_v0, %v572_v0  ;;  %v4128_v7 = vpack.c.b16 %v573_v1, %v573_v1  ;;  %v3279_v9 = vor.u32 %v3546_v63, %v3278_v62  ;;  %v3478_v11 = vld [vmem:[%s4021_s18 + $0x48c] sm:$0xf0]  ;;  %v3134_v12 = vld [vmem:[%s4021_s18 + $0x580] sm:$0xf]  ;;  %1803 = vmatpush.bf16.msrb.mxu3 %v2531_v60  ;;  %v2451_v6 = vor.u32 %v3336_v57, %v2448_v58  ;;  %v3380_v58 = vld [vmem:[%s4021_s18 + $0x184] sm:$0xf] }
  0x6c   : > { %v3510_v16 = vld [vmem:[%s4021_s18 + $0x58c] sm:$0xf0]  ;;  %v3262_v17 = vld [vmem:[%s4021_s18 + $0x680] sm:$0xf]  ;;  %1765 = vmatpush.bf16.msrb.mxu0 %v3023_v4  ;;  %v3007_v23 = vor.u32 %v3478_v11, %v3006_v10  ;;  %v340_v10 = vld [vmem:[%s4014_s8 + $0x10] sm:$0xff] }
  0x6d   : > { %v3542_v18 = vld [vmem:[%s4021_s18 + $0x68c] sm:$0xf0]  ;;  %1745 = vmatmul.bf16.vlgmr.msra.gmra.mxu2 %v4125_v5  ;;  %1758 = vmatmul.bf16.vlgmr.msra.gmra.mxu3 %v4128_v7  ;;  %v3135_v24 = vor.u32 %v3510_v16, %v3134_v12  ;;  %v2990_v26 = vld [vmem:[%s4021_s18 + $0x460] sm:$0xf]  ;;  %v3392_v11 = vld [vmem:[%s4021_s18 + $0x1e4] sm:$0xf] }
  0x6e   : > { %1778 = vmatpush.bf16.msrb.mxu1 %v3151_v8  ;;  %1791 = vmatpush.bf16.msrb.mxu2 %v3279_v9  ;;  %v3263_v25 = vor.u32 %v3542_v18, %v3262_v17  ;;  %v3474_v27 = vld [vmem:[%s4021_s18 + $0x46c] sm:$0xf0]  ;;  %v3118_v28 = vld [vmem:[%s4021_s18 + $0x560] sm:$0xf]  ;;  %v3332_v8 = vld [vmem:[%s4021_s18 + $0x4] sm:$0xf] }
  0x6f   : > { %1804 = vmatpush.bf16.msrb.mxu3 %v2515_v15  ;;  %v3506_v30 = vld [vmem:[%s4021_s18 + $0x56c] sm:$0xf0]  ;;  %v3246_v31 = vld [vmem:[%s4021_s18 + $0x660] sm:$0xf]  ;;  %v2991_v35 = vor.u32 %v3474_v27, %v2990_v26  ;;  %v2432_v9 = vld [vmem:[%s4021_s18 + $0x10] sm:$0xf0]  ;;  %v575_v26 = vunpack.c.h.b16 %v340_v10 }
  0x70   : > { %v3538_v32 = vld [vmem:[%s4021_s18 + $0x66c] sm:$0xf0]  ;;  %1766 = vmatpush.bf16.msrb.mxu0 %v3007_v23  ;;  %v3119_v36 = vor.u32 %v3506_v30, %v3118_v28  ;;  %v2974_v38 = vld [vmem:[%s4021_s18 + $0x440] sm:$0xf]  ;;  %v2672_v12 = vld [vmem:[%s4021_s18 + $0x1f0] sm:$0xf0]  ;;  %v2435_v27 = vor.u32 %v3332_v8, %v2432_v9 }
  0x71   : > { %v3247_v37 = vor.u32 %v3538_v32, %v3246_v31  ;;  %v3470_v39 = vld [vmem:[%s4021_s18 + $0x44c] sm:$0xf0]  ;;  %v3102_v40 = vld [vmem:[%s4021_s18 + $0x540] sm:$0xf]  ;;  %v2800_v15 = vld [vmem:[%s4021_s18 + $0x2f0] sm:$0xf0]  ;;  %v2675_v28 = vor.u32 %v3392_v11, %v2672_v12 }
  0x72   : > { %1779 = vmatpush.bf16.msrb.mxu1 %v3135_v24  ;;  %1792 = vmatpush.bf16.msrb.mxu2 %v3263_v25  ;;  %v3502_v42 = vld [vmem:[%s4021_s18 + $0x54c] sm:$0xf0]  ;;  %v3230_v43 = vld [vmem:[%s4021_s18 + $0x640] sm:$0xf]  ;;  %v2975_v47 = vor.u32 %v3470_v39, %v2974_v38  ;;  %v3456_v16 = vld [vmem:[%s4021_s18 + $0x3e4] sm:$0xf]  ;;  %v574_v25 = vunpack.c.l.b16 %v340_v10 }
  0x73   : > { %1805 = vmatpush.bf16.msrb.mxu3 %v2499_v29  ;;  %v3534_v44 = vld [vmem:[%s4021_s18 + $0x64c] sm:$0xf0]  ;;  %v3103_v48 = vor.u32 %v3502_v42, %v3102_v40  ;;  %v2958_v50 = vld [vmem:[%s4021_s18 + $0x420] sm:$0xf]  ;;  %v2928_v17 = vld [vmem:[%s4021_s18 + $0x3f0] sm:$0xf0]  ;;  %v2803_v29 = vor.u32 %v3424_v13, %v2800_v15  ;;  %v4200_v42 = vpack.c.b16 %v575_v26, %v575_v26 }
  0x74   : > { %1767 = vmatpush.bf16.msrb.mxu0 %v2991_v35  ;;  %v3231_v49 = vor.u32 %v3534_v44, %v3230_v43  ;;  %v3466_v51 = vld [vmem:[%s4021_s18 + $0x42c] sm:$0xf0]  ;;  %v3086_v52 = vld [vmem:[%s4021_s18 + $0x520] sm:$0xf]  ;;  %v3488_v23 = vld [vmem:[%s4021_s18 + $0x4e4] sm:$0xf]  ;;  %v2931_v30 = vor.u32 %v3456_v16, %v2928_v17 }
  0x75   : > { %v3498_v54 = vld [vmem:[%s4021_s18 + $0x52c] sm:$0xf0]  ;;  %v3214_v55 = vld [vmem:[%s4021_s18 + $0x620] sm:$0xf]  ;;  %v2959_v60 = vor.u32 %v3466_v51, %v2958_v50  ;;  %v3056_v24 = vld [vmem:[%s4021_s18 + $0x4f0] sm:$0xf0] }
  0x76   : > { %1780 = vmatpush.bf16.msrb.mxu1 %v3119_v36  ;;  %1793 = vmatpush.bf16.msrb.mxu2 %v3247_v37  ;;  %v3530_v56 = vld [vmem:[%s4021_s18 + $0x62c] sm:$0xf0]  ;;  %v2942_v59 = vld [vmem:[%s4021_s18 + $0x400] sm:$0xf]  ;;  %v3087_v0 = vor.u32 %v3498_v54, %v3086_v52  ;;  %v3388_v31 = vld [vmem:[%s4021_s18 + $0x1c4] sm:$0xf]  ;;  %v3059_v34 = vor.u32 %v3488_v23, %v3056_v24 }
  0x77   : > { %1806 = vmatpush.bf16.msrb.mxu3 %v2483_v41  ;;  %v3462_v61 = vld [vmem:[%s4021_s18 + $0x40c] sm:$0xf0]  ;;  %v3070_v62 = vld [vmem:[%s4021_s18 + $0x500] sm:$0xf]  ;;  %v3215_v1 = vor.u32 %v3530_v56, %v3214_v55  ;;  %v2656_v32 = vld [vmem:[%s4021_s18 + $0x1d0] sm:$0xf0]  ;;  %v4198_v41 = vpack.c.b16 %v574_v25, %v574_v25 }
  0x78   : > { %1768 = vmatpush.bf16.msrb.mxu0 %v2975_v47  ;;  %v3494_v63 = vld [vmem:[%s4021_s18 + $0x50c] sm:$0xf0]  ;;  %v3198_v2 = vld [vmem:[%s4021_s18 + $0x600] sm:$0xf]  ;;  %v2943_v14 = vor.u32 %v3462_v61, %v2942_v59  ;;  %v2784_v35 = vld [vmem:[%s4021_s18 + $0x2d0] sm:$0xf0]  ;;  %v2659_v43 = vor.u32 %v3388_v31, %v2656_v32 }
  0x79   : > { %v3526_v3 = vld [vmem:[%s4021_s18 + $0x60c] sm:$0xf0]  ;;  %v341_v4 = vld [vmem:[%s4014_s8 + $0x18] sm:$0xf]  ;;  %v3071_v19 = vor.u32 %v3494_v63, %v3070_v62  ;;  %v3452_v36 = vld [vmem:[%s4021_s18 + $0x3c4] sm:$0xf]  ;;  %v2787_v44 = vor.u32 %v3420_v33, %v2784_v35 }
  0x7a   : > { %1781 = vmatpush.bf16.msrb.mxu1 %v3103_v48  ;;  %1794 = vmatpush.bf16.msrb.mxu2 %v3231_v49  ;;  %v576_v18 = vunpack.c.l.b16 %v341_v4  ;;  %v3199_v20 = vor.u32 %v3526_v3, %v3198_v2  ;;  %v2912_v37 = vld [vmem:[%s4021_s18 + $0x3d0] sm:$0xf0]  ;;  %v3484_v39 = vld [vmem:[%s4021_s18 + $0x4c4] sm:$0xf] }
  0x7b   : > { %1807 = vmatpush.bf16.msrb.mxu3 %v2467_v53  ;;  %v3040_v40 = vld [vmem:[%s4021_s18 + $0x4d0] sm:$0xf0]  ;;  %v2915_v45 = vor.u32 %v3452_v36, %v2912_v37  ;;  %v3416_v48 = vld [vmem:[%s4021_s18 + $0x2a4] sm:$0xf] }
  0x7c   : > { %1769 = vmatpush.bf16.msrb.mxu0 %v2959_v60  ;;  %v4194_v38 = vpack.c.b16 %v576_v18, %v576_v18  ;;  %v2640_v47 = vld [vmem:[%s4021_s18 + $0x1b0] sm:$0xf0]  ;;  %v3043_v49 = vor.u32 %v3484_v39, %v3040_v40  ;;  %v3448_v51 = vld [vmem:[%s4021_s18 + $0x3a4] sm:$0xf] }
  0x7d   : > { %v2768_v50 = vld [vmem:[%s4021_s18 + $0x2b0] sm:$0xf0]  ;;  %v3480_v53 = vld [vmem:[%s4021_s18 + $0x4a4] sm:$0xf]  ;;  %v2643_v55 = vor.u32 %v3384_v46, %v2640_v47 }
  0x7e   : > { %1782 = vmatpush.bf16.msrb.mxu1 %v3087_v0  ;;  %1795 = vmatpush.bf16.msrb.mxu2 %v3215_v1  ;;  %v2896_v52 = vld [vmem:[%s4021_s18 + $0x3b0] sm:$0xf0]  ;;  %v2771_v56 = vor.u32 %v3416_v48, %v2768_v50  ;;  %v3412_v60 = vld [vmem:[%s4021_s18 + $0x284] sm:$0xf] }
  0x7f   : > { %1808 = vmatpush.bf16.msrb.mxu3 %v2451_v6  ;;  %v3024_v54 = vld [vmem:[%s4021_s18 + $0x4b0] sm:$0xf0]  ;;  %v2899_v57 = vor.u32 %v3448_v51, %v2896_v52  ;;  %v3444_v63 = vld [vmem:[%s4021_s18 + $0x384] sm:$0xf] }
  0x80   : > { %1770 = vmatpush.bf16.msrb.mxu0 %v2943_v14  ;;  %v2624_v59 = vld [vmem:[%s4021_s18 + $0x190] sm:$0xf0]  ;;  %v3027_v61 = vor.u32 %v3480_v53, %v3024_v54  ;;  %v3476_v1 = vld [vmem:[%s4021_s18 + $0x484] sm:$0xf] }
  0x81   : > { %v2752_v62 = vld [vmem:[%s4021_s18 + $0x290] sm:$0xf0]  ;;  %v2627_v3 = vor.u32 %v3380_v58, %v2624_v59  ;;  %v3376_v8 = vld [vmem:[%s4021_s18 + $0x164] sm:$0xf] }
  0x82   : > { %1783 = vmatpush.bf16.msrb.mxu1 %v3071_v19  ;;  %1796 = vmatpush.bf16.msrb.mxu2 %v3199_v20  ;;  %v2880_v0 = vld [vmem:[%s4021_s18 + $0x390] sm:$0xf0]  ;;  %v2755_v4 = vor.u32 %v3412_v60, %v2752_v62  ;;  %v3408_v10 = vld [vmem:[%s4021_s18 + $0x264] sm:$0xf] }
  0x83   : > { %1809 = vmatpush.bf16.msrb.mxu3 %v2435_v27  ;;  %1771 = vmatmul.bf16.vlgmr.msrb.gmra.mxu0 %v4198_v41  ;;  %v3008_v2 = vld [vmem:[%s4021_s18 + $0x490] sm:$0xf0]  ;;  %v2883_v6 = vor.u32 %v3444_v63, %v2880_v0  ;;  %v3440_v13 = vld [vmem:[%s4021_s18 + $0x364] sm:$0xf]  ;;  %v2550_v63 = vld [vmem:[%s4021_s18 + $0xe8] sm:$0xf] }
  0x84   : > { %1815 = vmatpush.bf16.msra.mxu0 %v2675_v28  ;;  %v2608_v9 = vld [vmem:[%s4021_s18 + $0x170] sm:$0xf0]  ;;  %v3011_v11 = vor.u32 %v3476_v1, %v3008_v2  ;;  %v3472_v15 = vld [vmem:[%s4021_s18 + $0x464] sm:$0xf]  ;;  %v3363_v0 = vld [vmem:[%s4021_s18 + $0xf4] sm:$0xf0] }
  0x85   : > { %1797 = vmatmul.bf16.vlgmr.msrb.gmra.mxu2 %v4194_v38  ;;  %1784 = vmatmul.bf16.vlgmr.msrb.gmra.mxu1 %v4200_v42  ;;  %v2736_v12 = vld [vmem:[%s4021_s18 + $0x270] sm:$0xf0]  ;;  %v2611_v17 = vor.u32 %v3376_v8, %v2608_v9  ;;  %v3372_v20 = vld [vmem:[%s4021_s18 + $0x144] sm:$0xf] }
  0x86   : > { %1828 = vmatpush.bf16.msra.mxu1 %v2803_v29  ;;  %1841 = vmatpush.bf16.msra.mxu2 %v2931_v30  ;;  %v2864_v14 = vld [vmem:[%s4021_s18 + $0x370] sm:$0xf0]  ;;  %v2739_v18 = vor.u32 %v3408_v10, %v2736_v12  ;;  %v3404_v24 = vld [vmem:[%s4021_s18 + $0x244] sm:$0xf]  ;;  %v2551_v10 = vor.u32 %v3363_v0, %v2550_v63 }
  0x87   : > { %1854 = vmatpush.bf16.msra.mxu3 %v3059_v34  ;;  %v2992_v16 = vld [vmem:[%s4021_s18 + $0x470] sm:$0xf0]  ;;  %v2867_v19 = vor.u32 %v3440_v13, %v2864_v14  ;;  %v3436_v27 = vld [vmem:[%s4021_s18 + $0x344] sm:$0xf] }
  0x88   : > { %1816 = vmatpush.bf16.msra.mxu0 %v2659_v43  ;;  %1810 = vmatmul.bf16.vlgmr.msrb.gmra.mxu3 %v4139_v21  ;;  %v2592_v23 = vld [vmem:[%s4021_s18 + $0x150] sm:$0xf0]  ;;  %v2995_v25 = vor.u32 %v3472_v15, %v2992_v16  ;;  %v3468_v29 = vld [vmem:[%s4021_s18 + $0x444] sm:$0xf]  ;;  %v2534_v16 = vld [vmem:[%s4021_s18 + $0xc8] sm:$0xf] }
  0x89   : > { %v2720_v26 = vld [vmem:[%s4021_s18 + $0x250] sm:$0xf0]  ;;  %v2595_v31 = vor.u32 %v3372_v20, %v2592_v23  ;;  %v3368_v34 = vld [vmem:[%s4021_s18 + $0x124] sm:$0xf] }
  0x8a   : > { %1829 = vmatpush.bf16.msra.mxu1 %v2787_v44  ;;  %1842 = vmatpush.bf16.msra.mxu2 %v2915_v45  ;;  %v2848_v28 = vld [vmem:[%s4021_s18 + $0x350] sm:$0xf0]  ;;  %v2723_v32 = vor.u32 %v3404_v24, %v2720_v26  ;;  %v3400_v36 = vld [vmem:[%s4021_s18 + $0x224] sm:$0xf] }
  0x8b   : > { %1855 = vmatpush.bf16.msra.mxu3 %v3043_v49  ;;  %v2976_v30 = vld [vmem:[%s4021_s18 + $0x450] sm:$0xf0]  ;;  %v2851_v33 = vor.u32 %v3436_v27, %v2848_v28  ;;  %v3432_v40 = vld [vmem:[%s4021_s18 + $0x324] sm:$0xf] }
  0x8c   : > { %1817 = vmatpush.bf16.msra.mxu0 %v2643_v55  ;;  %v2576_v35 = vld [vmem:[%s4021_s18 + $0x130] sm:$0xf0]  ;;  %v2979_v37 = vor.u32 %v3468_v29, %v2976_v30  ;;  %v3464_v44 = vld [vmem:[%s4021_s18 + $0x424] sm:$0xf]  ;;  %v2518_v30 = vld [vmem:[%s4021_s18 + $0xa8] sm:$0xf] }
  0x8d   : > { %v2704_v39 = vld [vmem:[%s4021_s18 + $0x230] sm:$0xf0]  ;;  %v2579_v46 = vor.u32 %v3368_v34, %v2576_v35  ;;  %v3364_v47 = vld [vmem:[%s4021_s18 + $0x104] sm:$0xf] }
  0x8e   : > { %1830 = vmatpush.bf16.msra.mxu1 %v2771_v56  ;;  %1843 = vmatpush.bf16.msra.mxu2 %v2899_v57  ;;  %v2832_v43 = vld [vmem:[%s4021_s18 + $0x330] sm:$0xf0]  ;;  %v2707_v49 = vor.u32 %v3400_v36, %v2704_v39  ;;  %v3396_v51 = vld [vmem:[%s4021_s18 + $0x204] sm:$0xf] }
  0x8f   : > { %1856 = vmatpush.bf16.msra.mxu3 %v3027_v61  ;;  %v2960_v45 = vld [vmem:[%s4021_s18 + $0x430] sm:$0xf0]  ;;  %v2835_v50 = vor.u32 %v3432_v40, %v2832_v43  ;;  %v3428_v53 = vld [vmem:[%s4021_s18 + $0x304] sm:$0xf] }
  0x90   : > { %1818 = vmatpush.bf16.msra.mxu0 %v2627_v3  ;;  %v2560_v48 = vld [vmem:[%s4021_s18 + $0x110] sm:$0xf0]  ;;  %v2963_v54 = vor.u32 %v3464_v44, %v2960_v45  ;;  %v3460_v56 = vld [vmem:[%s4021_s18 + $0x404] sm:$0xf]  ;;  %v2678_v3 = vld [vmem:[%s4021_s18 + $0x1e8] sm:$0xf] }
  0x91   : > { %v2688_v52 = vld [vmem:[%s4021_s18 + $0x210] sm:$0xf0]  ;;  %v3520_v58 = vld [vmem:[%s4021_s18 + $0x5e4] sm:$0xf]  ;;  %v2563_v61 = vor.u32 %v3364_v47, %v2560_v48  ;;  %v2502_v45 = vld [vmem:[%s4021_s18 + $0x88] sm:$0xf] }
  0x92   : > { %1831 = vmatpush.bf16.msra.mxu1 %v2755_v4  ;;  %1844 = vmatpush.bf16.msra.mxu2 %v2883_v6  ;;  %v2816_v55 = vld [vmem:[%s4021_s18 + $0x310] sm:$0xf0]  ;;  %v3552_v60 = vld [vmem:[%s4021_s18 + $0x6e4] sm:$0xf]  ;;  %v2691_v1 = vor.u32 %v3396_v51, %v2688_v52  ;;  %v3395_v4 = vld [vmem:[%s4021_s18 + $0x1f4] sm:$0xf0] }
  0x93   : > { %1857 = vmatpush.bf16.msra.mxu3 %v3011_v11  ;;  %v2944_v57 = vld [vmem:[%s4021_s18 + $0x410] sm:$0xf0]  ;;  %v2819_v2 = vor.u32 %v3428_v53, %v2816_v55  ;;  %v3516_v11 = vld [vmem:[%s4021_s18 + $0x5c4] sm:$0xf]  ;;  %v2679_v14 = vor.u32 %v3395_v4, %v2678_v3  ;;  %v2630_v47 = vld [vmem:[%s4021_s18 + $0x188] sm:$0xf] }
  0x94   : > { %1819 = vmatpush.bf16.msra.mxu0 %v2611_v17  ;;  %v3184_v59 = vld [vmem:[%s4021_s18 + $0x5f0] sm:$0xf0]  ;;  %v2947_v6 = vor.u32 %v3460_v56, %v2944_v57  ;;  %v3548_v13 = vld [vmem:[%s4021_s18 + $0x6c4] sm:$0xf]  ;;  %v3359_v17 = vld [vmem:[%s4021_s18 + $0xd4] sm:$0xf0] }
  0x95   : > { %v3312_v62 = vld [vmem:[%s4021_s18 + $0x6f0] sm:$0xf0]  ;;  %v3187_v8 = vor.u32 %v3520_v58, %v3184_v59  ;;  %v2535_v24 = vor.u32 %v3359_v17, %v2534_v16  ;;  %v3544_v27 = vld [vmem:[%s4021_s18 + $0x6a4] sm:$0xf]  ;;  %v3383_v48 = vld [vmem:[%s4021_s18 + $0x194] sm:$0xf0] }
  0x96   : > { %1832 = vmatpush.bf16.msra.mxu1 %v2739_v18  ;;  %1845 = vmatpush.bf16.msra.mxu2 %v2867_v19  ;;  %v3315_v9 = vor.u32 %v3552_v60, %v3312_v62  ;;  %v3168_v12 = vld [vmem:[%s4021_s18 + $0x5d0] sm:$0xf0]  ;;  %v2662_v18 = vld [vmem:[%s4021_s18 + $0x1c8] sm:$0xf]  ;;  %v3391_v19 = vld [vmem:[%s4021_s18 + $0x1d4] sm:$0xf0]  ;;  %v2631_v55 = vor.u32 %v3383_v48, %v2630_v47 }
  0x97   : > { %1858 = vmatpush.bf16.msra.mxu3 %v2995_v25  ;;  %v3296_v15 = vld [vmem:[%s4021_s18 + $0x6d0] sm:$0xf0]  ;;  %v3171_v20 = vor.u32 %v3516_v11, %v3168_v12  ;;  %v3512_v25 = vld [vmem:[%s4021_s18 + $0x5a4] sm:$0xf]  ;;  %v2663_v28 = vor.u32 %v3391_v19, %v2662_v18  ;;  %v2486_v57 = vld [vmem:[%s4021_s18 + $0x68] sm:$0xf] }
  0x98   : > { %1820 = vmatpush.bf16.msra.mxu0 %v2595_v31  ;;  %v3299_v23 = vor.u32 %v3548_v13, %v3296_v15  ;;  %v3152_v26 = vld [vmem:[%s4021_s18 + $0x5b0] sm:$0xf0]  ;;  %v3355_v31 = vld [vmem:[%s4021_s18 + $0xb4] sm:$0xf0]  ;;  %v3540_v40 = vld [vmem:[%s4021_s18 + $0x684] sm:$0xf] }
  0x99   : > { %v3280_v29 = vld [vmem:[%s4021_s18 + $0x6b0] sm:$0xf0]  ;;  %v3155_v34 = vor.u32 %v3512_v25, %v3152_v26  ;;  %v2519_v36 = vor.u32 %v3355_v31, %v2518_v30  ;;  %v3504_v52 = vld [vmem:[%s4021_s18 + $0x564] sm:$0xf]  ;;  %v3347_v58 = vld [vmem:[%s4021_s18 + $0x74] sm:$0xf0] }
  0x9a   : > { %1833 = vmatpush.bf16.msra.mxu1 %v2723_v32  ;;  %1846 = vmatpush.bf16.msra.mxu2 %v2851_v33  ;;  %v2646_v32 = vld [vmem:[%s4021_s18 + $0x1a8] sm:$0xf]  ;;  %v3387_v33 = vld [vmem:[%s4021_s18 + $0x1b4] sm:$0xf0]  ;;  %v3283_v35 = vor.u32 %v3544_v27, %v3280_v29  ;;  %v3136_v39 = vld [vmem:[%s4021_s18 + $0x590] sm:$0xf0]  ;;  %v2487_v63 = vor.u32 %v3347_v58, %v2486_v57 }
  0x9b   : > { %1859 = vmatpush.bf16.msra.mxu3 %v2979_v37  ;;  %v3508_v37 = vld [vmem:[%s4021_s18 + $0x584] sm:$0xf]  ;;  %v2647_v43 = vor.u32 %v3387_v33, %v2646_v32  ;;  %v3264_v44 = vld [vmem:[%s4021_s18 + $0x690] sm:$0xf0]  ;;  %v2614_v59 = vld [vmem:[%s4021_s18 + $0x168] sm:$0xf] }
  0x9c   : > { %1821 = vmatpush.bf16.msra.mxu0 %v2579_v46  ;;  %v3351_v46 = vld [vmem:[%s4021_s18 + $0x94] sm:$0xf0]  ;;  %v3120_v53 = vld [vmem:[%s4021_s18 + $0x570] sm:$0xf0]  ;;  %v3500_v0 = vld [vmem:[%s4021_s18 + $0x544] sm:$0xf] }
  0x9d   : > { %v2503_v51 = vor.u32 %v3351_v46, %v2502_v45  ;;  %v3248_v56 = vld [vmem:[%s4021_s18 + $0x670] sm:$0xf0]  ;;  %v3379_v60 = vld [vmem:[%s4021_s18 + $0x174] sm:$0xf0]  ;;  %v3528_v16 = vld [vmem:[%s4021_s18 + $0x624] sm:$0xf] }
  0x9e   : > { %1834 = vmatpush.bf16.msra.mxu1 %v2707_v49  ;;  %1847 = vmatpush.bf16.msra.mxu2 %v2835_v50  ;;  %v3139_v49 = vor.u32 %v3508_v37, %v3136_v39  ;;  %v3267_v50 = vor.u32 %v3540_v40, %v3264_v44  ;;  %v2615_v3 = vor.u32 %v3379_v60, %v2614_v59  ;;  %v3232_v4 = vld [vmem:[%s4021_s18 + $0x650] sm:$0xf0]  ;;  %v2454_v19 = vld [vmem:[%s4021_s18 + $0x28] sm:$0xf]  ;;  %v3492_v26 = vld [vmem:[%s4021_s18 + $0x504] sm:$0xf] }
  0x9f   : > { %1860 = vmatpush.bf16.msra.mxu3 %v2963_v54  ;;  %v3536_v54 = vld [vmem:[%s4021_s18 + $0x664] sm:$0xf]  ;;  %v3088_v15 = vld [vmem:[%s4021_s18 + $0x530] sm:$0xf0]  ;;  %v2438_v32 = vld [vmem:[%s4021_s18 + $0x8] sm:$0xf] }
  0xa0   : > { %1822 = vmatpush.bf16.msra.mxu0 %v2563_v61  ;;  %v3123_v61 = vor.u32 %v3504_v52, %v3120_v53  ;;  %v3251_v62 = vor.u32 %v3536_v54, %v3248_v56  ;;  %v3216_v18 = vld [vmem:[%s4021_s18 + $0x630] sm:$0xf0]  ;;  %v3524_v30 = vld [vmem:[%s4021_s18 + $0x604] sm:$0xf]  ;;  %v2806_v37 = vld [vmem:[%s4021_s18 + $0x2e8] sm:$0xf] }
  0xa1   : > { %v3072_v27 = vld [vmem:[%s4021_s18 + $0x510] sm:$0xf0]  ;;  %v3427_v39 = vld [vmem:[%s4021_s18 + $0x2f4] sm:$0xf0]  ;;  %v2934_v40 = vld [vmem:[%s4021_s18 + $0x3e8] sm:$0xf] }
  0xa2   : > { %1835 = vmatpush.bf16.msra.mxu1 %v2691_v1  ;;  %1848 = vmatpush.bf16.msra.mxu2 %v2819_v2  ;;  %v3104_v1 = vld [vmem:[%s4021_s18 + $0x550] sm:$0xf0]  ;;  %v3532_v2 = vld [vmem:[%s4021_s18 + $0x644] sm:$0xf]  ;;  %v3459_v44 = vld [vmem:[%s4021_s18 + $0x3f4] sm:$0xf0]  ;;  %v2807_v52 = vor.u32 %v3427_v39, %v2806_v37 }
  0xa3   : > { %1861 = vmatpush.bf16.msra.mxu3 %v2947_v6  ;;  %1823 = vmatmul.bf16.vlgmr.msra.gmra.mxu0 %v4142_v22  ;;  %v2470_v6 = vld [vmem:[%s4021_s18 + $0x48] sm:$0xf]  ;;  %v3107_v11 = vor.u32 %v3500_v0, %v3104_v1  ;;  %v3235_v12 = vor.u32 %v3532_v2, %v3232_v4  ;;  %v3200_v31 = vld [vmem:[%s4021_s18 + $0x610] sm:$0xf0]  ;;  %v3491_v46 = vld [vmem:[%s4021_s18 + $0x4f4] sm:$0xf0]  ;;  %v2935_v53 = vor.u32 %v3459_v44, %v2934_v40 }
  0xa4   : > { %1867 = vmatpush.bf16.msrb.mxu0 %v3187_v8  ;;  %v3343_v8 = vld [vmem:[%s4021_s18 + $0x54] sm:$0xf0]  ;;  %v3062_v45 = vld [vmem:[%s4021_s18 + $0x4e8] sm:$0xf]  ;;  %v3203_v47 = vor.u32 %v3524_v30, %v3200_v31 }
  0xa5   : > { %1849 = vmatmul.bf16.vlgmr.msra.gmra.mxu2 %v4128_v7  ;;  %1836 = vmatmul.bf16.vlgmr.msra.gmra.mxu1 %v4125_v5  ;;  %v2471_v13 = vor.u32 %v3343_v8, %v2470_v6  ;;  %v3063_v54 = vor.u32 %v3491_v46, %v3062_v45  ;;  %v3423_v56 = vld [vmem:[%s4021_s18 + $0x2d4] sm:$0xf0]  ;;  %v2918_v57 = vld [vmem:[%s4021_s18 + $0x3c8] sm:$0xf] }
  0xa6   : > { %1880 = vmatpush.bf16.msrb.mxu1 %v3315_v9  ;;  %1893 = vmatpush.bf16.msrb.mxu2 %v2551_v10  ;;  %v2598_v9 = vld [vmem:[%s4021_s18 + $0x148] sm:$0xf]  ;;  %v3375_v10 = vld [vmem:[%s4021_s18 + $0x154] sm:$0xf0] }
  0xa7   : > { %1906 = vmatpush.bf16.msrb.mxu3 %v2679_v14  ;;  %v3496_v14 = vld [vmem:[%s4021_s18 + $0x524] sm:$0xf]  ;;  %v2599_v17 = vor.u32 %v3375_v10, %v2598_v9  ;;  %v3455_v59 = vld [vmem:[%s4021_s18 + $0x3d4] sm:$0xf0]  ;;  %v3046_v60 = vld [vmem:[%s4021_s18 + $0x4c8] sm:$0xf] }
  0xa8   : > { %1862 = vmatmul.bf16.vlgmr.msra.gmra.mxu3 %v4198_v41  ;;  %1868 = vmatpush.bf16.msrb.mxu0 %v3171_v20  ;;  %v3339_v20 = vld [vmem:[%s4021_s18 + $0x34] sm:$0xf0]  ;;  %v3091_v25 = vor.u32 %v3496_v14, %v3088_v15  ;;  %v2919_v1 = vor.u32 %v3455_v59, %v2918_v57  ;;  %v2902_v6 = vld [vmem:[%s4021_s18 + $0x3a8] sm:$0xf] }
  0xa9   : > { %v2455_v29 = vor.u32 %v3339_v20, %v2454_v19  ;;  %v3419_v4 = vld [vmem:[%s4021_s18 + $0x2b4] sm:$0xf0]  ;;  %v3030_v10 = vld [vmem:[%s4021_s18 + $0x4a8] sm:$0xf] }
  0xaa   : > { %1881 = vmatpush.bf16.msrb.mxu1 %v3299_v23  ;;  %1894 = vmatpush.bf16.msrb.mxu2 %v2535_v24  ;;  %v2582_v23 = vld [vmem:[%s4021_s18 + $0x128] sm:$0xf]  ;;  %v3371_v24 = vld [vmem:[%s4021_s18 + $0x134] sm:$0xf0] }
  0xab   : > { %1907 = vmatpush.bf16.msrb.mxu3 %v2663_v28  ;;  %v3219_v28 = vor.u32 %v3528_v16, %v3216_v18  ;;  %v2583_v33 = vor.u32 %v3371_v24, %v2582_v23  ;;  %v3451_v9 = vld [vmem:[%s4021_s18 + $0x3b4] sm:$0xf0]  ;;  %v2886_v19 = vld [vmem:[%s4021_s18 + $0x388] sm:$0xf] }
  0xac   : > { %1869 = vmatpush.bf16.msrb.mxu0 %v3155_v34  ;;  %v3335_v34 = vld [vmem:[%s4021_s18 + $0x14] sm:$0xf0]  ;;  %v2903_v15 = vor.u32 %v3451_v9, %v2902_v6  ;;  %v3014_v24 = vld [vmem:[%s4021_s18 + $0x488] sm:$0xf] }
  0xad   : > { %v2439_v48 = vor.u32 %v3335_v34, %v2438_v32  ;;  %v3415_v18 = vld [vmem:[%s4021_s18 + $0x294] sm:$0xf0]  ;;  %v2742_v31 = vld [vmem:[%s4021_s18 + $0x268] sm:$0xf] }
  0xae   : > { %1882 = vmatpush.bf16.msrb.mxu1 %v3283_v35  ;;  %1895 = vmatpush.bf16.msrb.mxu2 %v2519_v36  ;;  %v2566_v35 = vld [vmem:[%s4021_s18 + $0x108] sm:$0xf]  ;;  %v3367_v36 = vld [vmem:[%s4021_s18 + $0x114] sm:$0xf0] }
  0xaf   : > { %1908 = vmatpush.bf16.msrb.mxu3 %v2647_v43  ;;  %v3075_v43 = vor.u32 %v3492_v26, %v3072_v27  ;;  %v3447_v23 = vld [vmem:[%s4021_s18 + $0x394] sm:$0xf0]  ;;  %v3142_v26 = vld [vmem:[%s4021_s18 + $0x588] sm:$0xf] }
  0xb0   : > { %1870 = vmatpush.bf16.msrb.mxu0 %v3139_v49  ;;  %v3190_v49 = vld [vmem:[%s4021_s18 + $0x5e8] sm:$0xf]  ;;  %v3511_v27 = vld [vmem:[%s4021_s18 + $0x594] sm:$0xf0] }
  0xb1   : > { %v3411_v32 = vld [vmem:[%s4021_s18 + $0x274] sm:$0xf0]  ;;  %v3143_v34 = vor.u32 %v3511_v27, %v3142_v26  ;;  %v3126_v39 = vld [vmem:[%s4021_s18 + $0x568] sm:$0xf] }
  0xb2   : > { %1883 = vmatpush.bf16.msrb.mxu1 %v3267_v50  ;;  %1896 = vmatpush.bf16.msrb.mxu2 %v2503_v51  ;;  %v3523_v50 = vld [vmem:[%s4021_s18 + $0x5f4] sm:$0xf0]  ;;  %v2567_v51 = vor.u32 %v3367_v36, %v2566_v35  ;;  %v2998_v36 = vld [vmem:[%s4021_s18 + $0x468] sm:$0xf] }
  0xb3   : > { %1909 = vmatpush.bf16.msrb.mxu3 %v2631_v55  ;;  %v2790_v55 = vld [vmem:[%s4021_s18 + $0x2c8] sm:$0xf]  ;;  %v3191_v58 = vor.u32 %v3523_v50, %v3190_v49  ;;  %v3443_v35 = vld [vmem:[%s4021_s18 + $0x374] sm:$0xf0] }
  0xb4   : > { %1871 = vmatpush.bf16.msrb.mxu0 %v3123_v61  ;;  %v3487_v61 = vld [vmem:[%s4021_s18 + $0x4d4] sm:$0xf0]  ;;  %v2791_v0 = vor.u32 %v3423_v56, %v2790_v55  ;;  %v2726_v46 = vld [vmem:[%s4021_s18 + $0x248] sm:$0xf] }
  0xb5   : > { %v3047_v2 = vor.u32 %v3487_v61, %v3046_v60  ;;  %v3475_v37 = vld [vmem:[%s4021_s18 + $0x474] sm:$0xf0]  ;;  %v2838_v60 = vld [vmem:[%s4021_s18 + $0x328] sm:$0xf] }
  0xb6   : > { %1884 = vmatpush.bf16.msrb.mxu1 %v3251_v62  ;;  %1897 = vmatpush.bf16.msrb.mxu2 %v2487_v63  ;;  %v3174_v62 = vld [vmem:[%s4021_s18 + $0x5c8] sm:$0xf]  ;;  %v3519_v63 = vld [vmem:[%s4021_s18 + $0x5d4] sm:$0xf0]  ;;  %v2999_v45 = vor.u32 %v3475_v37, %v2998_v36  ;;  %v3357_v36 = vld [vmem:[%s4021_s18 + $0xcc] sm:$0xf] }
  0xb7   : > { %1910 = vmatpush.bf16.msrb.mxu3 %v2615_v3  ;;  %v2774_v3 = vld [vmem:[%s4021_s18 + $0x2a8] sm:$0xf]  ;;  %v3175_v8 = vor.u32 %v3519_v63, %v3174_v62  ;;  %v3507_v40 = vld [vmem:[%s4021_s18 + $0x574] sm:$0xf0] }
  0xb8   : > { %1872 = vmatpush.bf16.msrb.mxu0 %v3107_v11  ;;  %v3483_v11 = vld [vmem:[%s4021_s18 + $0x4b4] sm:$0xf0]  ;;  %v2775_v14 = vor.u32 %v3419_v4, %v2774_v3  ;;  %v3127_v49 = vor.u32 %v3507_v40, %v3126_v39  ;;  %v2966_v63 = vld [vmem:[%s4021_s18 + $0x428] sm:$0xf]  ;;  %v2536_v39 = vld [vmem:[%s4021_s18 + $0xd8] sm:$0xf0] }
  0xb9   : > { %v3031_v16 = vor.u32 %v3483_v11, %v3030_v10  ;;  %v3439_v50 = vld [vmem:[%s4021_s18 + $0x354] sm:$0xf0]  ;;  %v2694_v4 = vld [vmem:[%s4021_s18 + $0x208] sm:$0xf]  ;;  %v3389_v40 = vld [vmem:[%s4021_s18 + $0x1cc] sm:$0xf] }
  0xba   : > { %1885 = vmatpush.bf16.msrb.mxu1 %v3235_v12  ;;  %1898 = vmatpush.bf16.msrb.mxu2 %v2471_v13  ;;  %v3158_v12 = vld [vmem:[%s4021_s18 + $0x5a8] sm:$0xf]  ;;  %v3515_v13 = vld [vmem:[%s4021_s18 + $0x5b4] sm:$0xf0] }
  0xbb   : > { %1911 = vmatpush.bf16.msrb.mxu3 %v2599_v17  ;;  %v2758_v17 = vld [vmem:[%s4021_s18 + $0x288] sm:$0xf]  ;;  %v3159_v20 = vor.u32 %v3515_v13, %v3158_v12  ;;  %v3403_v59 = vld [vmem:[%s4021_s18 + $0x234] sm:$0xf0] }
  0xbc   : > { %1873 = vmatpush.bf16.msrb.mxu0 %v3091_v25  ;;  %v3479_v25 = vld [vmem:[%s4021_s18 + $0x494] sm:$0xf0]  ;;  %v2822_v10 = vld [vmem:[%s4021_s18 + $0x308] sm:$0xf] }
  0xbd   : > { %v3015_v30 = vor.u32 %v3479_v25, %v3014_v24  ;;  %v3435_v62 = vld [vmem:[%s4021_s18 + $0x334] sm:$0xf0]  ;;  %v2950_v12 = vld [vmem:[%s4021_s18 + $0x408] sm:$0xf]  ;;  %v3393_v24 = vld [vmem:[%s4021_s18 + $0x1ec] sm:$0xf] }
  0xbe   : > { %1886 = vmatpush.bf16.msrb.mxu1 %v3219_v28  ;;  %1899 = vmatpush.bf16.msrb.mxu2 %v2455_v29  ;;  %v2759_v28 = vor.u32 %v3415_v18, %v2758_v17  ;;  %v2887_v29 = vor.u32 %v3447_v23, %v2886_v19  ;;  %v3399_v6 = vld [vmem:[%s4021_s18 + $0x214] sm:$0xf0]  ;;  %v3318_v17 = vld [vmem:[%s4021_s18 + $0x6e8] sm:$0xf]  ;;  %v3361_v19 = vld [vmem:[%s4021_s18 + $0xec] sm:$0xf] }
  0xbf   : > { %1912 = vmatpush.bf16.msrb.mxu3 %v2583_v33  ;;  %v2870_v33 = vld [vmem:[%s4021_s18 + $0x368] sm:$0xf]  ;;  %v3431_v11 = vld [vmem:[%s4021_s18 + $0x314] sm:$0xf0]  ;;  %v2552_v23 = vld [vmem:[%s4021_s18 + $0xf8] sm:$0xf0] }
  0xc0   : > { %1874 = vmatpush.bf16.msrb.mxu0 %v3075_v43  ;;  %v2743_v43 = vor.u32 %v3411_v32, %v2742_v31  ;;  %v2871_v44 = vor.u32 %v3443_v35, %v2870_v33  ;;  %v3555_v18 = vld [vmem:[%s4021_s18 + $0x6f4] sm:$0xf0]  ;;  %v2680_v25 = vld [vmem:[%s4021_s18 + $0x1f8] sm:$0xf0]  ;;  %v2823_v26 = vor.u32 %v3431_v11, %v2822_v10  ;;  %v2555_v32 = vor.u32 %v3361_v19, %v2552_v23  ;;  %v3254_v11 = vld [vmem:[%s4021_s18 + $0x668] sm:$0xf] }
  0xc1   : > { %v3319_v31 = vor.u32 %v3555_v18, %v3318_v17  ;;  %v2683_v33 = vor.u32 %v3393_v24, %v2680_v25  ;;  %v3551_v35 = vld [vmem:[%s4021_s18 + $0x6d4] sm:$0xf0]  ;;  %v2616_v17 = vld [vmem:[%s4021_s18 + $0x178] sm:$0xf0]  ;;  %v3409_v18 = vld [vmem:[%s4021_s18 + $0x26c] sm:$0xf] }
  0xc2   : > { %1887 = vmatpush.bf16.msrb.mxu1 %v3203_v47  ;;  %1900 = vmatpush.bf16.msrb.mxu2 %v2439_v48  ;;  %v3407_v47 = vld [vmem:[%s4021_s18 + $0x254] sm:$0xf0]  ;;  %v2854_v48 = vld [vmem:[%s4021_s18 + $0x348] sm:$0xf]  ;;  %v2744_v19 = vld [vmem:[%s4021_s18 + $0x278] sm:$0xf0] }
  0xc3   : > { %1913 = vmatpush.bf16.msrb.mxu3 %v2567_v51  ;;  %1875 = vmatmul.bf16.vlgmr.msrb.gmra.mxu0 %v4200_v42  ;;  %v2982_v51 = vld [vmem:[%s4021_s18 + $0x448] sm:$0xf]  ;;  %v2727_v55 = vor.u32 %v3407_v47, %v2726_v46  ;;  %v2855_v56 = vor.u32 %v3439_v50, %v2854_v48  ;;  %v2539_v47 = vor.u32 %v3357_v36, %v2536_v39  ;;  %v3547_v50 = vld [vmem:[%s4021_s18 + $0x6b4] sm:$0xf0] }
  0xc4   : > { %1919 = vmatpush.bf16.msra.mxu0 %v2807_v52  ;;  %v3471_v52 = vld [vmem:[%s4021_s18 + $0x454] sm:$0xf0]  ;;  %v3238_v25 = vld [vmem:[%s4021_s18 + $0x648] sm:$0xf] }
  0xc5   : > { %1888 = vmatmul.bf16.vlgmr.msrb.gmra.mxu1 %v4194_v38  ;;  %1901 = vmatmul.bf16.vlgmr.msrb.gmra.mxu2 %v4139_v21  ;;  %v2983_v57 = vor.u32 %v3471_v52, %v2982_v51  ;;  %v3353_v51 = vld [vmem:[%s4021_s18 + $0xac] sm:$0xf] }
  0xc6   : > { %1932 = vmatpush.bf16.msra.mxu1 %v2935_v53  ;;  %1945 = vmatpush.bf16.msra.mxu2 %v3063_v54  ;;  %v3110_v53 = vld [vmem:[%s4021_s18 + $0x548] sm:$0xf]  ;;  %v3503_v54 = vld [vmem:[%s4021_s18 + $0x554] sm:$0xf0] }
  0xc7   : > { %1958 = vmatpush.bf16.msra.mxu3 %v3191_v58  ;;  %v2710_v58 = vld [vmem:[%s4021_s18 + $0x228] sm:$0xf]  ;;  %v3111_v61 = vor.u32 %v3503_v54, %v3110_v53  ;;  %v2520_v53 = vld [vmem:[%s4021_s18 + $0xb8] sm:$0xf0]  ;;  %v3385_v54 = vld [vmem:[%s4021_s18 + $0x1ac] sm:$0xf] }
  0xc8   : > { %1920 = vmatpush.bf16.msra.mxu0 %v2791_v0  ;;  %1914 = vmatmul.bf16.vlgmr.msrb.gmra.mxu3 %v4142_v22  ;;  %v3467_v0 = vld [vmem:[%s4021_s18 + $0x434] sm:$0xf0]  ;;  %v2711_v3 = vor.u32 %v3403_v59, %v2710_v58  ;;  %v2523_v59 = vor.u32 %v3353_v51, %v2520_v53  ;;  %v3401_v51 = vld [vmem:[%s4021_s18 + $0x22c] sm:$0xf] }
  0xc9   : > { %v2967_v9 = vor.u32 %v3467_v0, %v2966_v63  ;;  %v3349_v63 = vld [vmem:[%s4021_s18 + $0x8c] sm:$0xf] }
  0xca   : > { %1933 = vmatpush.bf16.msra.mxu1 %v2919_v1  ;;  %1946 = vmatpush.bf16.msra.mxu2 %v3047_v2  ;;  %v3094_v1 = vld [vmem:[%s4021_s18 + $0x528] sm:$0xf]  ;;  %v3499_v2 = vld [vmem:[%s4021_s18 + $0x534] sm:$0xf0] }
  0xcb   : > { %1959 = vmatpush.bf16.msra.mxu3 %v3175_v8  ;;  %v2839_v8 = vor.u32 %v3435_v62, %v2838_v60  ;;  %v3095_v13 = vor.u32 %v3499_v2, %v3094_v1  ;;  %v3543_v62 = vld [vmem:[%s4021_s18 + $0x694] sm:$0xf0]  ;;  %v2504_v1 = vld [vmem:[%s4021_s18 + $0x98] sm:$0xf0]  ;;  %v3381_v2 = vld [vmem:[%s4021_s18 + $0x18c] sm:$0xf] }
  0xcc   : > { %1921 = vmatpush.bf16.msra.mxu0 %v2775_v14  ;;  %v3463_v14 = vld [vmem:[%s4021_s18 + $0x414] sm:$0xf0] }
  0xcd   : > { %v2951_v27 = vor.u32 %v3463_v14, %v2950_v12  ;;  %v3539_v12 = vld [vmem:[%s4021_s18 + $0x674] sm:$0xf0] }
  0xce   : > { %1934 = vmatpush.bf16.msra.mxu1 %v2903_v15  ;;  %1947 = vmatpush.bf16.msra.mxu2 %v3031_v16  ;;  %v3078_v15 = vld [vmem:[%s4021_s18 + $0x508] sm:$0xf]  ;;  %v3495_v16 = vld [vmem:[%s4021_s18 + $0x514] sm:$0xf0] }
  0xcf   : > { %1960 = vmatpush.bf16.msra.mxu3 %v3159_v20  ;;  %v2695_v20 = vor.u32 %v3399_v6, %v2694_v4  ;;  %v3413_v4 = vld [vmem:[%s4021_s18 + $0x28c] sm:$0xf]  ;;  %v2760_v6 = vld [vmem:[%s4021_s18 + $0x298] sm:$0xf0] }
  0xd0   : > { %1922 = vmatpush.bf16.msra.mxu0 %v2759_v28  ;;  %v3425_v28 = vld [vmem:[%s4021_s18 + $0x2ec] sm:$0xf]  ;;  %v2763_v14 = vor.u32 %v3413_v4, %v2760_v6 }
  0xd2   : > { %1935 = vmatpush.bf16.msra.mxu1 %v2887_v29  ;;  %1948 = vmatpush.bf16.msra.mxu2 %v3015_v30  ;;  %v2808_v29 = vld [vmem:[%s4021_s18 + $0x2f8] sm:$0xf0]  ;;  %v3079_v30 = vor.u32 %v3495_v16, %v3078_v15  ;;  %v3377_v16 = vld [vmem:[%s4021_s18 + $0x16c] sm:$0xf] }
  0xd3   : > { %1961 = vmatpush.bf16.msra.mxu3 %v3143_v34  ;;  %v3302_v34 = vld [vmem:[%s4021_s18 + $0x6c8] sm:$0xf]  ;;  %v2811_v37 = vor.u32 %v3425_v28, %v2808_v29  ;;  %v2488_v15 = vld [vmem:[%s4021_s18 + $0x78] sm:$0xf0]  ;;  %v2619_v24 = vor.u32 %v3377_v16, %v2616_v17  ;;  %v2747_v28 = vor.u32 %v3409_v18, %v2744_v19 }
  0xd4   : > { %1923 = vmatpush.bf16.msra.mxu0 %v2743_v43  ;;  %v2664_v43 = vld [vmem:[%s4021_s18 + $0x1d8] sm:$0xf0]  ;;  %v3303_v46 = vor.u32 %v3551_v35, %v3302_v34 }
  0xd5   : > { %v2667_v48 = vor.u32 %v3389_v40, %v2664_v43  ;;  %v2472_v29 = vld [vmem:[%s4021_s18 + $0x58] sm:$0xf0]  ;;  %v3222_v40 = vld [vmem:[%s4021_s18 + $0x628] sm:$0xf]  ;;  %v3531_v43 = vld [vmem:[%s4021_s18 + $0x634] sm:$0xf0] }
  0xd6   : > { %1936 = vmatpush.bf16.msra.mxu1 %v2871_v44  ;;  %1949 = vmatpush.bf16.msra.mxu2 %v2999_v45  ;;  %v3421_v44 = vld [vmem:[%s4021_s18 + $0x2cc] sm:$0xf]  ;;  %v2792_v45 = vld [vmem:[%s4021_s18 + $0x2d8] sm:$0xf0]  ;;  %v3223_v53 = vor.u32 %v3531_v43, %v3222_v40 }
  0xd7   : > { %1962 = vmatpush.bf16.msra.mxu3 %v3127_v49  ;;  %v3286_v49 = vld [vmem:[%s4021_s18 + $0x6a8] sm:$0xf]  ;;  %v2795_v52 = vor.u32 %v3421_v44, %v2792_v45  ;;  %v3337_v44 = vld [vmem:[%s4021_s18 + $0x2c] sm:$0xf]  ;;  %v2904_v40 = vld [vmem:[%s4021_s18 + $0x3b8] sm:$0xf0] }
  0xd8   : > { %1924 = vmatpush.bf16.msra.mxu0 %v2727_v55  ;;  %v2648_v55 = vld [vmem:[%s4021_s18 + $0x1b8] sm:$0xf0]  ;;  %v3287_v58 = vor.u32 %v3547_v50, %v3286_v49  ;;  %v3481_v43 = vld [vmem:[%s4021_s18 + $0x4ac] sm:$0xf] }
  0xd9   : > { %v2651_v60 = vor.u32 %v3385_v54, %v2648_v55  ;;  %v2584_v49 = vld [vmem:[%s4021_s18 + $0x138] sm:$0xf0]  ;;  %v3206_v54 = vld [vmem:[%s4021_s18 + $0x608] sm:$0xf]  ;;  %v3527_v55 = vld [vmem:[%s4021_s18 + $0x614] sm:$0xf0] }
  0xda   : > { %1937 = vmatpush.bf16.msra.mxu1 %v2855_v56  ;;  %1950 = vmatpush.bf16.msra.mxu2 %v2983_v57  ;;  %v3417_v56 = vld [vmem:[%s4021_s18 + $0x2ac] sm:$0xf]  ;;  %v2776_v57 = vld [vmem:[%s4021_s18 + $0x2b8] sm:$0xf0]  ;;  %v3207_v6 = vor.u32 %v3527_v55, %v3206_v54 }
  0xdb   : > { %1963 = vmatpush.bf16.msra.mxu3 %v3111_v61  ;;  %v3270_v61 = vld [vmem:[%s4021_s18 + $0x688] sm:$0xf]  ;;  %v2779_v0 = vor.u32 %v3417_v56, %v2776_v57  ;;  %v2888_v55 = vld [vmem:[%s4021_s18 + $0x398] sm:$0xf0] }
  0xdc   : > { %1925 = vmatpush.bf16.msra.mxu0 %v2711_v3  ;;  %v2632_v3 = vld [vmem:[%s4021_s18 + $0x198] sm:$0xf0] }
  0xdd   : > { %v2635_v10 = vor.u32 %v3381_v2, %v2632_v3  ;;  %v2936_v2 = vld [vmem:[%s4021_s18 + $0x3f8] sm:$0xf0]  ;;  %v3489_v3 = vld [vmem:[%s4021_s18 + $0x4ec] sm:$0xf] }
  0xde   : > { %1938 = vmatpush.bf16.msra.mxu1 %v2839_v8  ;;  %1951 = vmatpush.bf16.msra.mxu2 %v2967_v9  ;;  %v3271_v8 = vor.u32 %v3543_v62, %v3270_v61  ;;  %v2507_v9 = vor.u32 %v3349_v63, %v2504_v1  ;;  %v2568_v62 = vld [vmem:[%s4021_s18 + $0x118] sm:$0xf0]  ;;  %v3397_v63 = vld [vmem:[%s4021_s18 + $0x20c] sm:$0xf] }
  0xdf   : > { %1964 = vmatpush.bf16.msra.mxu3 %v3095_v13  ;;  %v3345_v13 = vld [vmem:[%s4021_s18 + $0x6c] sm:$0xf] }
  0xe0   : > { %1926 = vmatpush.bf16.msra.mxu0 %v2695_v20  ;;  %v3255_v20 = vor.u32 %v3539_v12, %v3254_v11  ;;  %v2491_v23 = vor.u32 %v3345_v13, %v2488_v15  ;;  %v1720_v34 = vpop.f32.mrf.mxu0  ;;  %v3457_v1 = vld [vmem:[%s4021_s18 + $0x3ec] sm:$0xf]  ;;  %v3320_v15 = vld [vmem:[%s4021_s18 + $0x6f8] sm:$0xf0] }
  0xe1   : > { %v1733_v36 = vpop.f32.mrf.mxu1  ;;  %v2939_v18 = vor.u32 %v3457_v1, %v2936_v2  ;;  %v3441_v1 = vld [vmem:[%s4021_s18 + $0x36c] sm:$0xf]  ;;  %v2872_v2 = vld [vmem:[%s4021_s18 + $0x378] sm:$0xf0] }
  0xe2   : > { %1939 = vmatpush.bf16.msra.mxu1 %v2823_v26  ;;  %1952 = vmatpush.bf16.msra.mxu2 %v2951_v27  ;;  %v3535_v26 = vld [vmem:[%s4021_s18 + $0x654] sm:$0xf0]  ;;  %v3341_v27 = vld [vmem:[%s4021_s18 + $0x4c] sm:$0xf] }
  0xe3   : > { %1965 = vmatpush.bf16.msra.mxu3 %v3079_v30  ;;  %1927 = vmatmul.bf16.vlgmr.msra.gmra.mxu0 %v4125_v5  ;;  %v3373_v30 = vld [vmem:[%s4021_s18 + $0x14c] sm:$0xf]  ;;  %v3239_v35 = vor.u32 %v3535_v26, %v3238_v25  ;;  %v2920_v26 = vld [vmem:[%s4021_s18 + $0x3d8] sm:$0xf0] }
  0xe4   : > { %1971 = vmatpush.bf16.msrb.mxu0 %v3319_v31  ;;  %v2600_v31 = vld [vmem:[%s4021_s18 + $0x158] sm:$0xf0]  ;;  %v3453_v25 = vld [vmem:[%s4021_s18 + $0x3cc] sm:$0xf] }
  0xe5   : > { %1953 = vmatmul.bf16.vlgmr.msra.gmra.mxu2 %v4198_v41  ;;  %1940 = vmatmul.bf16.vlgmr.msra.gmra.mxu1 %v4128_v7  ;;  %v2603_v39 = vor.u32 %v3373_v30, %v2600_v31  ;;  %v3517_v30 = vld [vmem:[%s4021_s18 + $0x5cc] sm:$0xf]  ;;  %v3176_v31 = vld [vmem:[%s4021_s18 + $0x5d8] sm:$0xf0] }
  0xe6   : > { %1984 = vmatpush.bf16.msrb.mxu1 %v2555_v32  ;;  %1997 = vmatpush.bf16.msrb.mxu2 %v2683_v33  ;;  %v3405_v32 = vld [vmem:[%s4021_s18 + $0x24c] sm:$0xf]  ;;  %v2728_v33 = vld [vmem:[%s4021_s18 + $0x258] sm:$0xf0] }
  0xe7   : > { %2010 = vmatpush.bf16.msrb.mxu3 %v2811_v37  ;;  %v2475_v37 = vor.u32 %v3341_v27, %v2472_v29  ;;  %v3485_v27 = vld [vmem:[%s4021_s18 + $0x4cc] sm:$0xf]  ;;  %v3048_v29 = vld [vmem:[%s4021_s18 + $0x4d8] sm:$0xf0] }
  0xe8   : > { %1966 = vmatmul.bf16.vlgmr.msra.gmra.mxu3 %v4200_v42  ;;  %1972 = vmatpush.bf16.msrb.mxu0 %v3303_v46  ;;  %v2731_v46 = vor.u32 %v3405_v32, %v2728_v33  ;;  %v1722_v4 = vpop.f32.mrf.mxu0  ;;  %v3549_v32 = vld [vmem:[%s4021_s18 + $0x6cc] sm:$0xf]  ;;  %v3304_v33 = vld [vmem:[%s4021_s18 + $0x6d8] sm:$0xf0] }
  0xe9   : > { %v1735_v11 = vpop.f32.mrf.mxu1 }
  0xea   : > { %1985 = vmatpush.bf16.msrb.mxu1 %v2539_v47  ;;  %1998 = vmatpush.bf16.msrb.mxu2 %v2667_v48  ;;  %v2456_v47 = vld [vmem:[%s4021_s18 + $0x38] sm:$0xf0]  ;;  %v3369_v48 = vld [vmem:[%s4021_s18 + $0x12c] sm:$0xf] }
  0xeb   : > { %2011 = vmatpush.bf16.msrb.mxu3 %v2795_v52  ;;  %v2712_v52 = vld [vmem:[%s4021_s18 + $0x238] sm:$0xf0]  ;;  %v2459_v56 = vor.u32 %v3337_v44, %v2456_v47  ;;  %v2587_v57 = vor.u32 %v3369_v48, %v2584_v49  ;;  %v3307_v44 = vor.u32 %v3549_v32, %v3304_v33  ;;  %v3513_v47 = vld [vmem:[%s4021_s18 + $0x5ac] sm:$0xf] }
  0xec   : > { %1973 = vmatpush.bf16.msrb.mxu0 %v3287_v58  ;;  %v3333_v58 = vld [vmem:[%s4021_s18 + $0xc] sm:$0xf]  ;;  %v2715_v61 = vor.u32 %v3401_v51, %v2712_v52  ;;  %v3160_v48 = vld [vmem:[%s4021_s18 + $0x5b8] sm:$0xf0] }
  0xed   : > { %v3545_v49 = vld [vmem:[%s4021_s18 + $0x6ac] sm:$0xf]  ;;  %v3163_v54 = vor.u32 %v3513_v47, %v3160_v48  ;;  %v3096_v48 = vld [vmem:[%s4021_s18 + $0x538] sm:$0xf0] }
  0xee   : > { %1986 = vmatpush.bf16.msrb.mxu1 %v2523_v59  ;;  %1999 = vmatpush.bf16.msrb.mxu2 %v2651_v60  ;;  %v2440_v59 = vld [vmem:[%s4021_s18 + $0x18] sm:$0xf0]  ;;  %v3365_v60 = vld [vmem:[%s4021_s18 + $0x10c] sm:$0xf] }
  0xef   : > { %2012 = vmatpush.bf16.msrb.mxu3 %v2779_v0  ;;  %v2696_v0 = vld [vmem:[%s4021_s18 + $0x218] sm:$0xf0]  ;;  %v2443_v12 = vor.u32 %v3333_v58, %v2440_v59  ;;  %v2571_v13 = vor.u32 %v3365_v60, %v2568_v62  ;;  %v3509_v58 = vld [vmem:[%s4021_s18 + $0x58c] sm:$0xf] }
  0xf0   : > { %1974 = vmatpush.bf16.msrb.mxu0 %v3271_v8  ;;  %v4445_v45 = vpop.f32.mrf.mxu2  ;;  %v4450_v50 = vpop.f32.mrf.mxu3  ;;  %v3064_v8 = vld [vmem:[%s4021_s18 + $0x4f8] sm:$0xf0]  ;;  %v2699_v17 = vor.u32 %v3397_v63, %v2696_v0  ;;  %v3541_v60 = vld [vmem:[%s4021_s18 + $0x68c] sm:$0xf] }
  0xf1   : > { %v3144_v59 = vld [vmem:[%s4021_s18 + $0x598] sm:$0xf0]  ;;  %v3537_v11 = vld [vmem:[%s4021_s18 + $0x66c] sm:$0xf] }
  0xf2   : > { %1987 = vmatpush.bf16.msrb.mxu1 %v2507_v9  ;;  %2000 = vmatpush.bf16.msrb.mxu2 %v2635_v10  ;;  %v3521_v9 = vld [vmem:[%s4021_s18 + $0x5ec] sm:$0xf]  ;;  %v3192_v10 = vld [vmem:[%s4021_s18 + $0x5f8] sm:$0xf0]  ;;  %v3147_v0 = vor.u32 %v3509_v58, %v3144_v59 }
  0xf3   : > { %2013 = vmatpush.bf16.msrb.mxu3 %v2763_v14  ;;  %v3553_v14 = vld [vmem:[%s4021_s18 + $0x6ec] sm:$0xf]  ;;  %v3080_v59 = vld [vmem:[%s4021_s18 + $0x518] sm:$0xf0] }
  0xf4   : > { %1975 = vmatpush.bf16.msrb.mxu0 %v3255_v20  ;;  %v3067_v20 = vor.u32 %v3489_v3, %v3064_v8  ;;  %v3473_v3 = vld [vmem:[%s4021_s18 + $0x46c] sm:$0xf]  ;;  %v3000_v8 = vld [vmem:[%s4021_s18 + $0x478] sm:$0xf0] }
  0xf5   : > { %v3497_v47 = vld [vmem:[%s4021_s18 + $0x52c] sm:$0xf] }
  0xf6   : > { %1988 = vmatpush.bf16.msrb.mxu1 %v2491_v23  ;;  %2001 = vmatpush.bf16.msrb.mxu2 %v2619_v24  ;;  %v3195_v23 = vor.u32 %v3521_v9, %v3192_v10  ;;  %v1734_v24 = vadd.f32 %v1733_v36, %v1720_v34  ;;  %v2923_v34 = vor.u32 %v3453_v25, %v2920_v26  ;;  %v3505_v9 = vld [vmem:[%s4021_s18 + $0x56c] sm:$0xf]  ;;  %v3128_v10 = vld [vmem:[%s4021_s18 + $0x578] sm:$0xf0] }
  0xf7   : > { %2014 = vmatpush.bf16.msrb.mxu3 %v2747_v28  ;;  %v3323_v28 = vor.u32 %v3553_v14, %v3320_v15  ;;  %v3179_v36 = vor.u32 %v3517_v30, %v3176_v31  ;;  %v2875_v14 = vor.u32 %v3441_v1, %v2872_v2  ;;  %v3437_v15 = vld [vmem:[%s4021_s18 + $0x34c] sm:$0xf]  ;;  %v2984_v25 = vld [vmem:[%s4021_s18 + $0x458] sm:$0xf0] }
  0xf8   : > { %1976 = vmatpush.bf16.msrb.mxu0 %v3239_v35  ;;  %v1748_v16 = vpop.f32.mrf.mxu2  ;;  %v1761_v19 = vpop.f32.mrf.mxu3  ;;  %v3051_v35 = vor.u32 %v3485_v27, %v3048_v29  ;;  %v3501_v26 = vld [vmem:[%s4021_s18 + $0x54c] sm:$0xf]  ;;  %v3112_v27 = vld [vmem:[%s4021_s18 + $0x558] sm:$0xf0] }
  0xf9   : > { %v3003_v16 = vor.u32 %v3473_v3, %v3000_v8  ;;  %v3469_v19 = vld [vmem:[%s4021_s18 + $0x44c] sm:$0xf]  ;;  %v3240_v30 = vld [vmem:[%s4021_s18 + $0x658] sm:$0xf0] }
  0xfa   : > { %1989 = vmatpush.bf16.msrb.mxu1 %v2475_v37  ;;  %2002 = vmatpush.bf16.msrb.mxu2 %v2603_v39  ;;  %v1747_v37 = vadd.f32 %v4445_v45, %v1734_v24  ;;  %v3449_v39 = vld [vmem:[%s4021_s18 + $0x3ac] sm:$0xf]  ;;  %v3288_v45 = vld [vmem:[%s4021_s18 + $0x6b8] sm:$0xf0] }
  0xfb   : > { %2015 = vmatpush.bf16.msrb.mxu3 %v2731_v46  ;;  %v3032_v46 = vld [vmem:[%s4021_s18 + $0x4b8] sm:$0xf0]  ;;  %v2907_v51 = vor.u32 %v3449_v39, %v2904_v40  ;;  %v3533_v29 = vld [vmem:[%s4021_s18 + $0x64c] sm:$0xf]  ;;  %v3115_v39 = vor.u32 %v3501_v26, %v3112_v27 }
  0xfc   : > { %1977 = vmatpush.bf16.msrb.mxu0 %v3223_v53  ;;  %v1760_v52 = vadd.f32 %v4450_v50, %v1747_v37  ;;  %v3035_v53 = vor.u32 %v3481_v43, %v3032_v46  ;;  %v2987_v37 = vor.u32 %v3469_v19, %v2984_v25  ;;  %v2840_v40 = vld [vmem:[%s4021_s18 + $0x338] sm:$0xf0]  ;;  %v3465_v43 = vld [vmem:[%s4021_s18 + $0x42c] sm:$0xf]  ;;  %v3243_v46 = vor.u32 %v3533_v29, %v3240_v30 }
  0xfd   : > { %v3493_v58 = vld [vmem:[%s4021_s18 + $0x50c] sm:$0xf] }
  0xfe   : > { %1990 = vmatpush.bf16.msrb.mxu1 %v2459_v56  ;;  %2003 = vmatpush.bf16.msrb.mxu2 %v2587_v57  ;;  %v3291_v56 = vor.u32 %v3545_v49, %v3288_v45  ;;  %v3016_v57 = vld [vmem:[%s4021_s18 + $0x498] sm:$0xf0]  ;;  %v3529_v49 = vld [vmem:[%s4021_s18 + $0x62c] sm:$0xf] }
  0xff   : > { %2016 = vmatpush.bf16.msrb.mxu3 %v2715_v61  ;;  %v3224_v45 = vld [vmem:[%s4021_s18 + $0x638] sm:$0xf0] }
 0x100   : > { %1978 = vmatpush.bf16.msrb.mxu0 %v3207_v6  ;;  %v1772_v61 = vpop.f32.mrf.mxu0 }
 0x101   : > { %v1773_v4 = vadd.f32 %v1772_v61, %v1760_v52 }
 0x102   : > { %1991 = vmatpush.bf16.msrb.mxu1 %v2443_v12  ;;  %2004 = vmatpush.bf16.msrb.mxu2 %v2571_v13  ;;  %v1785_v62 = vpop.f32.mrf.mxu1  ;;  %v3256_v12 = vld [vmem:[%s4021_s18 + $0x678] sm:$0xf0] }
 0x103   : > { %2017 = vmatpush.bf16.msrb.mxu3 %v2699_v17  ;;  %1979 = vmatmul.bf16.vlgmr.msrb.gmra.mxu0 %v4194_v38  ;;  %v1786_v13 = vadd.f32 %v1785_v62, %v1773_v4  ;;  %v3131_v17 = vor.u32 %v3505_v9, %v3128_v10  ;;  %v3259_v24 = vor.u32 %v3537_v11, %v3256_v12 }
 0x104   : > { %2023 = vmatpush.bf16.msra.mxu0 %v2939_v18  ;;  %v2856_v18 = vld [vmem:[%s4021_s18 + $0x358] sm:$0xf0] }
 0x105   : > { %2005 = vmatmul.bf16.vlgmr.msrb.gmra.mxu2 %v4142_v22  ;;  %1992 = vmatmul.bf16.vlgmr.msrb.gmra.mxu1 %v4139_v21  ;;  %v3445_v22 = vld [vmem:[%s4021_s18 + $0x38c] sm:$0xf]  ;;  %v3272_v21 = vld [vmem:[%s4021_s18 + $0x698] sm:$0xf0]  ;;  %v2859_v32 = vor.u32 %v3437_v15, %v2856_v18 }
 0x106   : > { %2036 = vmatpush.bf16.msra.mxu1 %v3067_v20  ;;  %2049 = vmatpush.bf16.msra.mxu2 %v3195_v23  ;;  %v2891_v50 = vor.u32 %v3445_v22, %v2888_v55  ;;  %v3275_v6 = vor.u32 %v3541_v60, %v3272_v21  ;;  %v334_v20 = vld [vmem:[#allocation2 + $0x10] sm:$0xff]  ;;  %v3461_v55 = vld [vmem:[%s4021_s18 + $0x40c] sm:$0xf] }
 0x107   : > { %2062 = vmatpush.bf16.msra.mxu3 %v3323_v28  ;;  %v2824_v22 = vld [vmem:[%s4021_s18 + $0x318] sm:$0xf0]  ;;  %v3525_v60 = vld [vmem:[%s4021_s18 + $0x60c] sm:$0xf] }
 0x108   : > { %2018 = vmatmul.bf16.vlgmr.msrb.gmra.mxu3 %v4125_v5  ;;  %2024 = vmatpush.bf16.msra.mxu0 %v2923_v34  ;;  %v3477_v5 = vld [vmem:[%s4021_s18 + $0x48c] sm:$0xf]  ;;  %v1798_v23 = vpop.f32.mrf.mxu2  ;;  %v3208_v21 = vld [vmem:[%s4021_s18 + $0x618] sm:$0xf0] }
 0x109   : > { %v3019_v63 = vor.u32 %v3477_v5, %v3016_v57  ;;  %v1799_v28 = vadd.f32 %v1798_v23, %v1786_v13  ;;  %v3433_v34 = vld [vmem:[%s4021_s18 + $0x32c] sm:$0xf]  ;;  %v2952_v57 = vld [vmem:[%s4021_s18 + $0x418] sm:$0xf0] }
 0x10a   : > { %2037 = vmatpush.bf16.msra.mxu1 %v3051_v35  ;;  %2050 = vmatpush.bf16.msra.mxu2 %v3179_v36  ;;  %v1774_v35 = vpop.f32.mrf.mxu0  ;;  %v1787_v36 = vpop.f32.mrf.mxu1  ;;  %v2955_v62 = vor.u32 %v3461_v55, %v2952_v57 }
 0x10b   : > { %2063 = vmatpush.bf16.msra.mxu3 %v3307_v44  ;;  %v4516_v31 = vpop.f32.mrf.mxu3  ;;  %v2075_v33 = vadd.f32 %v1799_v28, %v334_v20  ;;  %v2968_v44 = vld [vmem:[%s4021_s18 + $0x438] sm:$0xf0] }
 0x10c   : > { %2025 = vmatpush.bf16.msra.mxu0 %v2907_v51  ;;  %v2843_v51 = vor.u32 %v3433_v34, %v2840_v40  ;;  %v2971_v52 = vor.u32 %v3465_v43, %v2968_v44 }
 0x10d   : > { %2079 = vst [vmem:[#allocation2 + $0x10] sm:$0xff] %v2075_v33 }
 0x10e   : > { %2038 = vmatpush.bf16.msra.mxu1 %v3035_v53  ;;  %2051 = vmatpush.bf16.msra.mxu2 %v3163_v54  ;;  %v3099_v53 = vor.u32 %v3497_v47, %v3096_v48  ;;  %v3429_v54 = vld [vmem:[%s4021_s18 + $0x30c] sm:$0xf] }
 0x10f   : > { %2064 = vmatpush.bf16.msra.mxu3 %v3291_v56  ;;  %v3227_v56 = vor.u32 %v3529_v49, %v3224_v45  ;;  %v2827_v61 = vor.u32 %v3429_v54, %v2824_v22 }
 0x110   : > { %2026 = vmatpush.bf16.msra.mxu0 %v2891_v50  ;;  %v1800_v5 = vpop.f32.mrf.mxu2 }
 0x112   : > { %2039 = vmatpush.bf16.msra.mxu1 %v3019_v63  ;;  %2052 = vmatpush.bf16.msra.mxu2 %v3147_v0  ;;  %v3083_v63 = vor.u32 %v3493_v58, %v3080_v59  ;;  %v3211_v0 = vor.u32 %v3525_v60, %v3208_v21  ;;  %v337_v21 = vld [vmem:[#allocation2 + $0x8] sm:$0xff] }
 0x113   : > { %2065 = vmatpush.bf16.msra.mxu3 %v3275_v6  ;;  %v1813_v50 = vpop.f32.mrf.mxu3 }
 0x114   : > { %2027 = vmatpush.bf16.msra.mxu0 %v2875_v14 }
 0x116   : > { %2040 = vmatpush.bf16.msra.mxu1 %v3003_v16  ;;  %2053 = vmatpush.bf16.msra.mxu2 %v3131_v17  ;;  %v335_v16 = vld [vmem:[#allocation2] sm:$0xff] }
 0x117   : > { %2066 = vmatpush.bf16.msra.mxu3 %v3259_v24 }
 0x118   : > { %2028 = vmatpush.bf16.msra.mxu0 %v2859_v32 }
 0x11a   : > { %2041 = vmatpush.bf16.msra.mxu1 %v2987_v37  ;;  %2054 = vmatpush.bf16.msra.mxu2 %v3115_v39  ;;  %v336_v39 = vld [vmem:[#allocation2 + $0x18] sm:$0xff] }
 0x11b   : > { %2067 = vmatpush.bf16.msra.mxu3 %v3243_v46 }
 0x11c   : > { %2029 = vmatpush.bf16.msra.mxu0 %v2843_v51 }
 0x11e   : > { %2042 = vmatpush.bf16.msra.mxu1 %v2971_v52  ;;  %2055 = vmatpush.bf16.msra.mxu2 %v3099_v53 }
 0x11f   : > { %2068 = vmatpush.bf16.msra.mxu3 %v3227_v56 }
 0x120   : > { %2030 = vmatpush.bf16.msra.mxu0 %v2827_v61  ;;  %v1824_v1 = vpop.f32.mrf.mxu0 }
 0x121   : > { %v1825_v11 = vadd.f32 %v1824_v1, %v4516_v31 }
 0x122   : > { %2043 = vmatpush.bf16.msra.mxu1 %v2955_v62  ;;  %2056 = vmatpush.bf16.msra.mxu2 %v3083_v63  ;;  %v1837_v2 = vpop.f32.mrf.mxu1 }
 0x123   : > { %2069 = vmatpush.bf16.msra.mxu3 %v3211_v0  ;;  %2031 = vmatmul.bf16.vlgmr.msra.gmra.mxu0 %v4128_v7  ;;  %v1838_v12 = vadd.f32 %v1837_v2, %v1825_v11 }
 0x125   : > { %2044 = vmatmul.bf16.vlgmr.msra.gmra.mxu1 %v4198_v41  ;;  %2057 = vmatmul.bf16.vlgmr.msra.gmra.mxu2 %v4200_v42 }
 0x126   : > { %2070 = vmatmul.bf16.vlgmr.msra.gmra.mxu3 %v4194_v38 }
 0x128   : > { %v1850_v3 = vpop.f32.mrf.mxu2  ;;  %v1826_v6 = vpop.f32.mrf.mxu0 }
 0x129   : > { %v1851_v13 = vadd.f32 %v1850_v3, %v1838_v12 }
 0x12a   : > { %v1839_v8 = vpop.f32.mrf.mxu1 }
 0x12b   : > { %v1863_v4 = vpop.f32.mrf.mxu3 }
 0x12c   : > { %v1864_v14 = vadd.f32 %v1863_v4, %v1851_v13 }
 0x130   : > { %v1852_v9 = vpop.f32.mrf.mxu2 }
 0x133   : > { %v1865_v10 = vpop.f32.mrf.mxu3 }
 0x140   : > { %v1876_v7 = vpop.f32.mrf.mxu0 }
 0x141   : > { %v1877_v15 = vadd.f32 %v1876_v7, %v1864_v14 }
 0x142   : > { %v1889_v41 = vpop.f32.mrf.mxu1 }
 0x143   : > { %v1890_v42 = vadd.f32 %v1889_v41, %v1877_v15 }
 0x145   : > { %v2076_v17 = vadd.f32 %v1890_v42, %v335_v16 }
 0x147   : > { %2080 = vst [vmem:[#allocation2] sm:$0xff] %v2076_v17 }
 0x148   : > { %v1902_v38 = vpop.f32.mrf.mxu2  ;;  %v1878_v19 = vpop.f32.mrf.mxu0 }
 0x14a   : > { %v1891_v20 = vpop.f32.mrf.mxu1 }
 0x14b   : > { %v1915_v18 = vpop.f32.mrf.mxu3 }
 0x14c   : > { %v1916_v31 = vadd.f32 %v1915_v18, %v1902_v38 }
 0x150   : > { %v1904_v23 = vpop.f32.mrf.mxu2 }
 0x153   : > { %v1917_v24 = vpop.f32.mrf.mxu3 }
 0x160   : > { %v1928_v25 = vpop.f32.mrf.mxu0 }
 0x161   : > { %v1929_v34 = vadd.f32 %v1928_v25, %v1916_v31 }
 0x162   : > { %v1941_v26 = vpop.f32.mrf.mxu1 }
 0x163   : > { %v1942_v35 = vadd.f32 %v1941_v26, %v1929_v34 }
 0x168   : > { %v1954_v27 = vpop.f32.mrf.mxu2  ;;  %v1930_v29 = vpop.f32.mrf.mxu0 }
 0x169   : > { %v1955_v36 = vadd.f32 %v1954_v27, %v1942_v35 }
 0x16a   : > { %v1943_v30 = vpop.f32.mrf.mxu1 }
 0x16b   : > { %v1967_v28 = vpop.f32.mrf.mxu3 }
 0x16c   : > { %v1968_v37 = vadd.f32 %v1967_v28, %v1955_v36 }
 0x170   : > { %v1956_v32 = vpop.f32.mrf.mxu2 }
 0x173   : > { %v1969_v33 = vpop.f32.mrf.mxu3 }
 0x180   : > { %v1980_v40 = vpop.f32.mrf.mxu0 }
 0x181   : > { %v1981_v43 = vadd.f32 %v1980_v40, %v1968_v37 }
 0x182   : > { %v1993_v44 = vpop.f32.mrf.mxu1 }
 0x183   : > { %v2077_v46 = vadd.f32 %v1981_v43, %v336_v39 }
 0x185   : > { %2081 = vst [vmem:[#allocation2 + $0x18] sm:$0xff] %v2077_v46 }
 0x188   : > { %v2006_v47 = vpop.f32.mrf.mxu2  ;;  %v1982_v49 = vpop.f32.mrf.mxu0 }
 0x189   : > { %v2007_v53 = vadd.f32 %v2006_v47, %v1993_v44 }
 0x18a   : > { %v1995_v45 = vpop.f32.mrf.mxu1 }
 0x18b   : > { %v2019_v48 = vpop.f32.mrf.mxu3 }
 0x18c   : > { %v2020_v54 = vadd.f32 %v2019_v48, %v2007_v53 }
 0x190   : > { %v2008_v51 = vpop.f32.mrf.mxu2 }
 0x193   : > { %v2021_v52 = vpop.f32.mrf.mxu3 }
 0x1a0   : > { %v2032_v22 = vpop.f32.mrf.mxu0 }
 0x1a1   : > { %v2033_v5 = vadd.f32 %v2032_v22, %v2020_v54 }
 0x1a2   : > { %v2045_v55 = vpop.f32.mrf.mxu1 }
 0x1a3   : > { %v2046_v56 = vadd.f32 %v2045_v55, %v2033_v5 }
 0x1a8   : > { %v2058_v57 = vpop.f32.mrf.mxu2  ;;  %v2034_v60 = vpop.f32.mrf.mxu0 }
 0x1a9   : > { %v2059_v58 = vadd.f32 %v2058_v57, %v2046_v56  ;;  %v2071_v59 = vpop.f32.mrf.mxu3 }
 0x1aa   : > { %v2047_v50 = vpop.f32.mrf.mxu1 }
 0x1ab   : > { %v2072_v61 = vadd.f32 %v2071_v59, %v2059_v58 }
 0x1ad   : > { %v2078_v62 = vadd.f32 %v2072_v61, %v337_v21  ;;  %2086 = sbr.rel (%p3324_p1) target bundleno = 877 (0x36d), region = 64 }
 0x1af   : > { %2082 = vst [vmem:[#allocation2 + $0x8] sm:$0xff] %v2078_v62 }
 0x1b0   : > { %v2060_v63 = vpop.f32.mrf.mxu2 }
 0x1b1   : > { %v2073_v0 = vpop.f32.mrf.mxu3 }
 0x1b2   : > { %v2172_v1 = vld [vmem:[%s4760_s3 + $0x178] sm:$0xff]  ;;  %v2171_v3 = vld [vmem:[%s4760_s3 + $0x170] sm:$0xff]  ;;  %v2170_v9 = vld [vmem:[%s4760_s3 + $0x168] sm:$0xff]  ;;  %vm2273_vm0 = vcmask 39936  }
 0x1b3   : > { %v2140_v2 = vld [vmem:[%s4760_s3 + $0x78] sm:$0xff]  ;;  %2233 = vmatpush.msra.mxu2 %v2172_v1  ;;  %v2139_v6 = vld [vmem:[%s4760_s3 + $0x70] sm:$0xff]  ;;  %v2138_v11 = vld [vmem:[%s4760_s3 + $0x68] sm:$0xff] }
 0x1b4   : > { %2193 = vmatpush.msra.mxu0 %v2140_v2  ;;  %v2188_v4 = vld [vmem:[%s4760_s3 + $0x1f8] sm:$0xff]  ;;  %v2187_v10 = vld [vmem:[%s4760_s3 + $0x1f0] sm:$0xff]  ;;  %v2186_v13 = vld [vmem:[%s4760_s3 + $0x1e8] sm:$0xff] }
 0x1b5   : > { %v2156_v8 = vld [vmem:[%s4760_s3 + $0xf8] sm:$0xff]  ;;  %2253 = vmatpush.msra.mxu3 %v2188_v4  ;;  %2234 = vmatpush.msra.mxu2 %v2171_v3  ;;  %v2155_v12 = vld [vmem:[%s4760_s3 + $0xf0] sm:$0xff]  ;;  %v2169_v14 = vld [vmem:[%s4760_s3 + $0x160] sm:$0xff] }
 0x1b6   : > { %2213 = vmatpush.msra.mxu1 %v2156_v8  ;;  %2194 = vmatpush.msra.mxu0 %v2139_v6  ;;  %v2137_v7 = vld [vmem:[%s4760_s3 + $0x60] sm:$0xff]  ;;  %v2154_v15 = vld [vmem:[%s4760_s3 + $0xe8] sm:$0xff]  ;;  %v2168_v42 = vld [vmem:[%s4760_s3 + $0x158] sm:$0xff] }
 0x1b7   : > { %2254 = vmatpush.msra.mxu3 %v2187_v10  ;;  %2235 = vmatpush.msra.mxu2 %v2170_v9  ;;  %v2185_v41 = vld [vmem:[%s4760_s3 + $0x1e0] sm:$0xff]  ;;  %v2136_v17 = vld [vmem:[%s4760_s3 + $0x58] sm:$0xff]  ;;  %v2167_v19 = vld [vmem:[%s4760_s3 + $0x150] sm:$0xff] }
 0x1b8   : > { %2214 = vmatpush.msra.mxu1 %v2155_v12  ;;  %2195 = vmatpush.msra.mxu0 %v2138_v11  ;;  %v2153_v16 = vld [vmem:[%s4760_s3 + $0xe0] sm:$0xff]  ;;  %v2184_v38 = vld [vmem:[%s4760_s3 + $0x1d8] sm:$0xff]  ;;  %v2135_v20 = vld [vmem:[%s4760_s3 + $0x50] sm:$0xff] }
 0x1b9   : > { %2255 = vmatpush.msra.mxu3 %v2186_v13  ;;  %2236 = vmatpush.msra.mxu2 %v2169_v14  ;;  %v2152_v18 = vld [vmem:[%s4760_s3 + $0xd8] sm:$0xff]  ;;  %v2183_v23 = vld [vmem:[%s4760_s3 + $0x1d0] sm:$0xff]  ;;  %v2166_v25 = vld [vmem:[%s4760_s3 + $0x148] sm:$0xff] }
 0x1ba   : > { %2215 = vmatpush.msra.mxu1 %v2154_v15  ;;  %2196 = vmatpush.msra.mxu0 %v2137_v7  ;;  %v2151_v24 = vld [vmem:[%s4760_s3 + $0xd0] sm:$0xff]  ;;  %v2134_v26 = vld [vmem:[%s4760_s3 + $0x48] sm:$0xff]  ;;  %v2165_v29 = vld [vmem:[%s4760_s3 + $0x140] sm:$0xff] }
 0x1bb   : > { %2256 = vmatpush.msra.mxu3 %v2185_v41  ;;  %2237 = vmatpush.msra.mxu2 %v2168_v42  ;;  %v2182_v27 = vld [vmem:[%s4760_s3 + $0x1c8] sm:$0xff]  ;;  %v2133_v30 = vld [vmem:[%s4760_s3 + $0x40] sm:$0xff]  ;;  %v2164_v33 = vld [vmem:[%s4760_s3 + $0x138] sm:$0xff] }
 0x1bc   : > { %2216 = vmatpush.msra.mxu1 %v2153_v16  ;;  %2197 = vmatpush.msra.mxu0 %v2136_v17  ;;  %v2150_v28 = vld [vmem:[%s4760_s3 + $0xc8] sm:$0xff]  ;;  %v2181_v31 = vld [vmem:[%s4760_s3 + $0x1c0] sm:$0xff]  ;;  %v2132_v34 = vld [vmem:[%s4760_s3 + $0x38] sm:$0xff] }
 0x1bd   : > { %2257 = vmatpush.msra.mxu3 %v2184_v38  ;;  %2238 = vmatpush.msra.mxu2 %v2167_v19  ;;  %v2149_v32 = vld [vmem:[%s4760_s3 + $0xc0] sm:$0xff]  ;;  %v2180_v35 = vld [vmem:[%s4760_s3 + $0x1b8] sm:$0xff]  ;;  %v2163_v37 = vld [vmem:[%s4760_s3 + $0x130] sm:$0xff] }
 0x1be   : > { %2217 = vmatpush.msra.mxu1 %v2152_v18  ;;  %2198 = vmatpush.msra.mxu0 %v2135_v20  ;;  %v2148_v36 = vld [vmem:[%s4760_s3 + $0xb8] sm:$0xff]  ;;  %v2131_v39 = vld [vmem:[%s4760_s3 + $0x30] sm:$0xff]  ;;  %v2162_v44 = vld [vmem:[%s4760_s3 + $0x128] sm:$0xff] }
 0x1bf   : > { %2258 = vmatpush.msra.mxu3 %v2183_v23  ;;  %2239 = vmatpush.msra.mxu2 %v2166_v25  ;;  %v2179_v40 = vld [vmem:[%s4760_s3 + $0x1b0] sm:$0xff]  ;;  %v2130_v46 = vld [vmem:[%s4760_s3 + $0x28] sm:$0xff]  ;;  %v2161_v47 = vld [vmem:[%s4760_s3 + $0x120] sm:$0xff] }
 0x1c0   : > { %2218 = vmatpush.msra.mxu1 %v2151_v24  ;;  %2199 = vmatpush.msra.mxu0 %v2134_v26  ;;  %v2147_v43 = vld [vmem:[%s4760_s3 + $0xb0] sm:$0xff]  ;;  %v2178_v48 = vld [vmem:[%s4760_s3 + $0x1a8] sm:$0xff]  ;;  %v2129_v49 = vld [vmem:[%s4760_s3 + $0x20] sm:$0xff] }
 0x1c1   : > { %2259 = vmatpush.msra.mxu3 %v2182_v27  ;;  %2240 = vmatpush.msra.mxu2 %v2165_v29  ;;  %v2146_v45 = vld [vmem:[%s4760_s3 + $0xa8] sm:$0xff]  ;;  %v2160_v51 = vld [vmem:[%s4760_s3 + $0x118] sm:$0xff]  ;;  %v2177_v54 = vld [vmem:[%s4760_s3 + $0x1a0] sm:$0xff] }
 0x1c2   : > { %2219 = vmatpush.msra.mxu1 %v2150_v28  ;;  %2200 = vmatpush.msra.mxu0 %v2133_v30  ;;  %v2089_v52 = vld [vmem:[#allocation2 + $0x18] sm:$0xff]  ;;  %v2145_v22 = vld [vmem:[%s4760_s3 + $0xa0] sm:$0xff]  ;;  %v2087_v5 = vld [vmem:[#allocation2 + $0x10] sm:$0xff] }
 0x1c3   : > { %2260 = vmatpush.msra.mxu3 %v2181_v31  ;;  %2241 = vmatpush.msra.mxu2 %v2164_v33  ;;  %v2091_v53 = vld [vmem:[#allocation8] sm:$0xf]  ;;  %v2090_v59 = vld [vmem:[#allocation2 + $0x8] sm:$0xff]  ;;  %v2088_v60 = vld [vmem:[#allocation2] sm:$0xff] }
 0x1c4   : > { %2220 = vmatpush.msra.mxu1 %v2149_v32  ;;  %2201 = vmatpush.msra.mxu0 %v2132_v34  ;;  %v2095_v55 = vperm.slane %v2091_v53, 2  ;;  %v2093_v56 = vperm.slane %v2091_v53, 0  ;;  %v2096_v57 = vperm.slane %v2091_v53, 3  ;;  %v2128_v58 = vld [vmem:[%s4760_s3 + $0x18] sm:$0xff]  ;;  %v2094_v21 = vperm.slane %v2091_v53, 1  ;;  %v2159_v1 = vld [vmem:[%s4760_s3 + $0x110] sm:$0xff] }
 0x1c5   : > { %2261 = vmatpush.msra.mxu3 %v2180_v35  ;;  %2242 = vmatpush.msra.mxu2 %v2163_v37  ;;  %v2176_v50 = vld [vmem:[%s4760_s3 + $0x198] sm:$0xff]  ;;  %v2127_v2 = vld [vmem:[%s4760_s3 + $0x10] sm:$0xff]  ;;  %v2158_v4 = vld [vmem:[%s4760_s3 + $0x108] sm:$0xff] }
 0x1c6   : > { %2221 = vmatpush.msra.mxu1 %v2148_v36  ;;  %2202 = vmatpush.msra.mxu0 %v2131_v39  ;;  %v2144_v61 = vld [vmem:[%s4760_s3 + $0x98] sm:$0xff]  ;;  %v2103_v62 = vadd.f32 %v2095_v55, %v2089_v52  ;;  %v2101_v63 = vadd.f32 %v2093_v56, %v2087_v5  ;;  %v2104_v0 = vadd.f32 %v2096_v57, %v2090_v59  ;;  %v2175_v6 = vld [vmem:[%s4760_s3 + $0x190] sm:$0xff]  ;;  %v2126_v12 = vld [vmem:[%s4760_s3 + $0x8] sm:$0xff] }
 0x1c7   : > { %2262 = vmatpush.msra.mxu3 %v2179_v40  ;;  %2243 = vmatpush.msra.mxu2 %v2162_v44  ;;  %v2102_v3 = vadd.f32 %v2094_v21, %v2088_v60  ;;  %v2143_v8 = vld [vmem:[%s4760_s3 + $0x90] sm:$0xff]  ;;  %v2174_v13 = vld [vmem:[%s4760_s3 + $0x188] sm:$0xff]  ;;  %v2157_v42 = vld [vmem:[%s4760_s3 + $0x100] sm:$0xff] }
 0x1c8   : > { %2222 = vmatpush.msra.mxu1 %v2147_v43  ;;  %2203 = vmatpush.msra.mxu0 %v2130_v46  ;;  %v2107_v9 = vsub.f32 0.0, %v2103_v62  ;;  %v2105_v10 = vsub.f32 0.0, %v2101_v63  ;;  %v2108_v11 = vsub.f32 0.0, %v2104_v0  ;;  %v2142_v14 = vld [vmem:[%s4760_s3 + $0x88] sm:$0xff]  ;;  %v2125_v17 = vld [vmem:[%s4760_s3] sm:$0xff] }
 0x1c9   : > { %2263 = vmatpush.msra.mxu3 %v2178_v48  ;;  %2244 = vmatpush.msra.mxu2 %v2161_v47  ;;  %v2106_v7 = vsub.f32 0.0, %v2102_v3  ;;  %v2173_v18 = vld [vmem:[%s4760_s3 + $0x180] sm:$0xff]  ;;  %v3652_v34 = vld [vmem:[#allocation9] ss:$0 sm:$0xff] }
 0x1ca   : > { %2223 = vmatpush.msra.mxu1 %v2146_v45  ;;  %2204 = vmatpush.msra.mxu0 %v2129_v49  ;;  %v2113_v15 = vmul.f32 1.442695, %v2107_v9  ;;  %v2109_v41 = vmul.f32 1.442695, %v2105_v10  ;;  %v2115_v16 = vmul.f32 1.442695, %v2108_v11 }
 0x1cb   : > { %2264 = vmatpush.msra.mxu3 %v2177_v54  ;;  %2245 = vmatpush.msra.mxu2 %v2160_v51  ;;  %v2111_v38 = vmul.f32 1.442695, %v2106_v7  ;;  %v2141_v19 = vld [vmem:[%s4760_s3 + $0x80] sm:$0xff] }
 0x1cc   : > { %2224 = vmatpush.msra.mxu1 %v2145_v22  ;;  %2205 = vmatpush.msra.mxu0 %v2128_v58  ;;  %3653 = vpow2.f32 %v2113_v15 }
 0x1cd   : > { %2265 = vmatpush.msra.mxu3 %v2176_v50  ;;  %2246 = vmatpush.msra.mxu2 %v2159_v1  ;;  %3655 = vpow2.f32 %v2109_v41 }
 0x1ce   : > { %2225 = vmatpush.msra.mxu1 %v2144_v61  ;;  %2206 = vmatpush.msra.mxu0 %v2127_v2  ;;  %3657 = vpow2.f32 %v2115_v16 }
 0x1cf   : > { %2266 = vmatpush.msra.mxu3 %v2175_v6  ;;  %2247 = vmatpush.msra.mxu2 %v2158_v4  ;;  %3659 = vpow2.f32 %v2111_v38 }
 0x1d0   : > { %2226 = vmatpush.msra.mxu1 %v2143_v8  ;;  %2207 = vmatpush.msra.mxu0 %v2126_v12 }
 0x1d1   : > { %2267 = vmatpush.msra.mxu3 %v2174_v13  ;;  %2248 = vmatpush.msra.mxu2 %v2157_v42 }
 0x1d2   : > { %2227 = vmatpush.msra.mxu1 %v2142_v14  ;;  %2208 = vmatpush.msra.mxu0 %v2125_v17  ;;  %v3654_v20 = vpop.eup %3653 }
 0x1d3   : > { %2268 = vmatpush.msra.mxu3 %v2173_v18  ;;  %v3656_v23 = vpop.eup %3655  ;;  %v2119_v24 = vadd.f32 1.0, %v3654_v20 }
 0x1d4   : > { %2228 = vmatpush.msra.mxu1 %v2141_v19  ;;  %v3658_v25 = vpop.eup %3657  ;;  %v2117_v26 = vadd.f32 1.0, %v3656_v23 }
 0x1d5   : > { %v3660_v27 = vpop.eup %3659  ;;  %3661 = vrcp.f32 %v2119_v24  ;;  %v2120_v28 = vadd.f32 1.0, %v3658_v25 }
 0x1d6   : > { %3663 = vrcp.f32 %v2117_v26  ;;  %v2118_v29 = vadd.f32 1.0, %v3660_v27 }
 0x1d7   : > { %3665 = vrcp.f32 %v2120_v28 }
 0x1d8   : > { %3667 = vrcp.f32 %v2118_v29 }
 0x1db   : > { %v3662_v30 = vpop.eup %3661 }
 0x1dc   : > { %v3664_v31 = vpop.eup %3663  ;;  %2249 = vmatmul.f32.vlgmr.msra.gmra.mxu2 %v3662_v30 }
 0x1dd   : > { %v3666_v32 = vpop.eup %3665  ;;  %2209 = vmatmul.f32.vlgmr.msra.gmra.mxu0 %v3664_v31 }
 0x1de   : > { %v3668_v33 = vpop.eup %3667  ;;  %2269 = vmatmul.f32.vlgmr.msra.gmra.mxu3 %v3666_v32 }
 0x1df   : > { %2229 = vmatmul.f32.vlgmr.msra.gmra.mxu1 %v3668_v33 }
 0x25a   : > { %v2210_v35 = vpop.f32.mrf.mxu0 }
 0x25b   : > { %v2211_v36 = vadd.f32 %v3652_v34, %v2210_v35 }
 0x25c   : > { %v2230_v37 = vpop.f32.mrf.mxu1 }
 0x25d   : > { %v2231_v39 = vadd.f32 %v2230_v37, %v2211_v36 }
 0x25f   : > { %v2250_v40 = vpop.f32.mrf.mxu2 }
 0x260   : > { %v2251_v43 = vadd.f32 %v2250_v40, %v2231_v39 }
 0x261   : > { %v2270_v44 = vpop.f32.mrf.mxu3 }
 0x262   : > { %v2271_v46 = vadd.f32 %v2270_v44, %v2251_v43 }
 0x264   : > { %v2274_v47 = vsel %vm2273_vm0, %v2271_v46, -inf }
 0x265   : > { %2275 = vmax.xlane.f32.xlu0 %v2274_v47 }
 0x2d8   : > { %v2276_v48 = vpop.xlane.xlu0 %2275 }
 0x2d9   : > { %v2277_v49 = vsub.f32 %v2271_v46, %v2276_v48 }
 0x2db   : > { %v2278_v45 = vmul.f32 1.442695, %v2277_v49 }
 0x2dd   : > { %3669 = vpow2.f32 %v2278_v45 }
 0x2e3   : > { %v3670_v51 = vpop.eup %3669 }
 0x2e4   : > { %v2280_v52 = vsel %vm2273_vm0, %v3670_v51, 0.0 }
 0x2e5   : > { %2281 = vadd.xlane.f32.xlu0 %v2280_v52 }
 0x358   : > { %v2282_v53 = vpop.xlane.xlu0 %2281 }
 0x359   : > { %3671 = vrcp.f32 %v2282_v53  ;;  %v2294_v5 = vand.u32 2147483648, %v2282_v53  ;;  %v2292_v57 = vand.u32 2147483647, %v2282_v53  ;;  %vm2288_vm2 = vweird.f32 %v2282_v53 }
 0x35b   : > { %v2295_v59 = vor.u32 1.1754944e-38, %v2294_v5  ;;  %vm2293_vm4 = vcmp.eq.f32.partialorder %v2292_v57, 8.507059e+37 }
 0x35f   : > { %v3672_v54 = vpop.eup %3671 }
 0x360   : > { %v2284_v22 = vmul.f32 %v3672_v54, %v2282_v53  ;;  %vm2289_vm1 = vweird.f32 %v3672_v54 }
 0x361   : > { %vm2290_vm3 = vmor %vm2288_vm2, %vm2289_vm1 }
 0x362   : > { %v2285_v55 = vsub.f32 1.0, %v2284_v22 }
 0x364   : > { %v2286_v56 = vmul.f32 %v3672_v54, %v2285_v55 }
 0x366   : > { %v2287_v58 = vadd.f32 %v3672_v54, %v2286_v56 }
 0x368   : > { %v2291_v60 = vsel %vm2290_vm3, %v3672_v54, %v2287_v58 }
 0x369   : > { %v2296_v21 = vsel %vm2293_vm4, %v2295_v59, %v2291_v60 }
 0x36a   : > { %v2297_v50 = vmul.f32 %v3670_v51, %v2296_v21 }
 0x36c   : > { %2298 = vst.msk [vmem:[#allocation11] sm:$0xff] %vm2273_vm0, %v2297_v50 }
 0x36d PF: > { %p3596_p3 = scmp.eq.s32.totalorder %s3954_s24, 2  ;;  %s2309_s11 = sshll.u32 %s4762_s5, 4  ;;  %s2310_s11 = int_to_ptr.hbm [resolvable:$true] %s2309_s11 }
 0x36e   : > { %s3894_s15 = smov [#allocation11]  }
 0x36f   : > { %s2307_s13 = sshll.u32 %s3894_s15, 4  ;;  %s2308_s13 = int_to_ptr.vmem [resolvable:$true] %s2307_s13 }
 0x370   : > { %3574 = dma.vmem_to_hbm [thread:$0]  (%p3596_p3), %s2308_s13, 128, %s2310_s11, [#allocation5]  }
 0x371   : > { %3862 = dma.done.wait (%p3596_p3), [#allocation5], 128  }
 0x372   : > { %3864 = vsyncadd (%p3596_p3), [#allocation5], 4294967168 }
 0x373 PF: > { %s23_s23 = sadd.s32 1, %s3887_s23   ;;  %s4772_s24 = sld [smem:[#allocation17_spill]] }
 0x374   : > { %p20_p4 = scmp.ge.s32.totalorder %s23_s23, 5   ;;  %s4773_s18 = smov %s3871_s19 }
 0x375   : > { %s4774_s19 = smov %s3875_s20  ;;  %s4775_s20 = smov %s3997_s26 }
 0x376   : > { %s4776_s21 = smov %s3883_s22  ;;  %22 = sbr.rel (!%p20_p4) target bundleno = 11 (0xb), region = 107 }
 0x379   : > { %s4777_s22 = smov %s4772_s24 }
 0x37b   :  { %2323 = vsyncpa [#allocation4], 1 }
 0x37c   :  { %2325 = vsyncpa [#allocation4 + $0x1], 1 }
 0x37d   :  { %2326 = vsyncpa [#allocation7], 1 }
 0x37e   :  { %2328 = vsyncpa [#allocation7 + $0x1], 1 }
 0x37f   :  { %2329 = vsyncpa [#allocation10], 1 }
 0x380   :  { %2330 = vsyncpa [#allocation5], 1 }
 0x381   :  { %2332 = vsyncpa [#allocation5 + $0x1], 1 }

</bundles_post_ra>
